<compile_context>
chip_gen: v6e
topology: v6e:2x2x1
jax: 0.10.0
libtpu: 0.0.40
codegen_flags: <defaults>
</compile_context>

<pallas_src>
import jax
import jax.numpy as jnp
from jax.experimental import pallas as pl
from jax.experimental.pallas import tpu as pltpu

LN_EPS = 1e-5       # torch.nn.LayerNorm default
NEG_BIG = -1e30     # finite "-inf" for the causal mask (avoids inf-inf -> NaN)


def _layernorm(x, gamma, beta):
    mu = jnp.mean(x, axis=-1, keepdims=True)
    var = jnp.mean((x - mu) ** 2, axis=-1, keepdims=True)
    return (x - mu) * jax.lax.rsqrt(var + LN_EPS) * gamma + beta


# --------------------------------------------------------------------------- #
# Fused forward kernel: all Blocks + final LayerNorm + vocab projection.
# One grid step == one batch row-band (grid=(B,), "parallel").
# --------------------------------------------------------------------------- #
def fused_kernel(x_ref, bias_ref,
                 ln1g_ref, ln1b_ref, wqkv_ref, wo_ref, bo_ref,
                 ln2g_ref, ln2b_ref, w1_ref, b1_ref, w2_ref, b2_ref,
                 lnfg_ref, lnfb_ref, wout_ref, bout_ref,
                 logits_ref, attn_ref):
    f32 = jnp.float32
    bf16 = jnp.bfloat16

    x = x_ref[0]                        # (T, E) f32 residual stream, resident all layers
    H, T, _ = bias_ref.shape
    E = x.shape[-1]
    L = wqkv_ref.shape[0]
    hs = E // H

    bias = bias_ref[...]                # (H, T, T) — read ONCE, reused by every layer

    for l in range(L):                  # static layer loop — x never leaves VMEM
        # ---- LayerNorm 1 + fused QKV projection (single wide MXU op, scale pre-folded) ----
        xn = _layernorm(x, ln1g_ref[l], ln1b_ref[l]).astype(bf16)
        qkv = jnp.dot(xn, wqkv_ref[l], preferred_element_type=f32).astype(bf16)   # (T, 3E)

        # Head-major stacks (H, T, hs) from static lane slices (major-axis concat only).
        q = jnp.stack([qkv[:, h * hs:(h + 1) * hs] for h in range(H)], axis=0)
        k = jnp.stack([qkv[:, E + h * hs:E + (h + 1) * hs] for h in range(H)], axis=0)
        v = jnp.stack([qkv[:, 2 * E + h * hs:2 * E + (h + 1) * hs] for h in range(H)], axis=0)

        # ---- head-batched ALiBi attention (no per-(batch, head) Python loops) ----
        s = jnp.einsum('hqd,hkd->hqk', q, k, preferred_element_type=f32) + bias   # (H, T, T)
        s = s - jnp.max(s, axis=-1, keepdims=True)
        p = jnp.exp(s)
        p = p * pl.reciprocal(jnp.sum(p, axis=-1, keepdims=True), approx=True)    # softmax rows

        if l == L - 1:
            # Only the last block's maps are kept by the module; single consolidated store.
            # (Last dim is T=8 lanes; at this size padding to 128 lanes would cost more
            #  in-kernel assembly than the one tiny masked store it removes.)
            attn_ref[0] = p.astype(attn_ref.dtype)

        ctx = jnp.einsum('hqk,hkd->hqd', p.astype(bf16), v, preferred_element_type=f32)
        # Fold W_o per head (batched) and reduce over the major head axis:
        # replaces the head-concat VMEM scratch + reload with register-level work.
        attn_out = jnp.einsum('hqd,hde->hqe', ctx.astype(bf16), wo_ref[l],
                              preferred_element_type=f32)
        x = x + jnp.sum(attn_out, axis=0) + bo_ref[l]          # residual 1

        # ---- LayerNorm 2 + FFN (E -> 128 [padded from 100] -> E, ReLU) + residual 2 ----
        xn2 = _layernorm(x, ln2g_ref[l], ln2b_ref[l]).astype(bf16)
        h1 = jnp.maximum(
            jnp.dot(xn2, w1_ref[l], preferred_element_type=f32) + b1_ref[l], 0.0)
        x = x + jnp.dot(h1.astype(bf16), w2_ref[l], preferred_element_type=f32) + b2_ref[l]

    # ---- final LayerNorm + lane-dense (vocab padded to 128) projection ----
    xn = _layernorm(x, lnfg_ref[...], lnfb_ref[...]).astype(bf16)
    logits = jnp.dot(xn, wout_ref[...], preferred_element_type=f32) + bout_ref[...]
    logits_ref[0] = logits.astype(logits_ref.dtype)


def run_fused(x, params):
    """x: (B, T, E) embedded tokens. Returns (logits (B, T, V_pad), attn (B, H, T, T))."""
    B, T, E = x.shape
    bias = params["alibi_bias"]                  # (H, T, T)
    H = bias.shape[0]
    V_pad = params["w_out"].shape[-1]

    def full(a):
        nd = a.ndim
        return pl.BlockSpec(a.shape, lambda b, nd=nd: (0,) * nd)

    weights = (bias,
               params["ln1_g"], params["ln1_b"], params["wqkv"], params["wo_h"], params["bo"],
               params["ln2_g"], params["ln2_b"],
               params["w1"], params["b1"], params["w2"], params["b2"],
               params["lnf_g"], params["lnf_b"], params["w_out"], params["b_out"])

    logits, attn = pl.pallas_call(
        fused_kernel,
        grid=(B,),   # "parallel" batch row-bands: uses both TCs on v7x, harmless elsewhere.
        in_specs=[pl.BlockSpec((1, T, E), lambda b: (b, 0, 0))] + [full(a) for a in weights],
        out_specs=[
            pl.BlockSpec((1, T, V_pad), lambda b: (b, 0, 0)),
            pl.BlockSpec((1, H, T, T), lambda b: (b, 0, 0, 0)),
        ],
        out_shape=[
            jax.ShapeDtypeStruct((B, T, V_pad), jnp.float32),
            jax.ShapeDtypeStruct((B, H, T, T), jnp.float32),
        ],
        compiler_params=pltpu.CompilerParams(dimension_semantics=("parallel",)),
    )(x, *weights)
    return logits, attn


# --------------------------------------------------------------------------- #
# Parameter init + ALiBi bias precompute + full forward
# --------------------------------------------------------------------------- #
def make_alibi_bias(num_heads, T):
    """(H, T, T) additive bias: (j - i) * slope_h for j <= i, NEG_BIG above the diagonal."""
    slope0 = 2.0 ** (-8.0 / num_heads)
    slopes = jnp.asarray([slope0 ** (h + 1) for h in range(num_heads)], jnp.float32)
    i = jax.lax.broadcasted_iota(jnp.int32, (T, T), 0)
    j = jax.lax.broadcasted_iota(jnp.int32, (T, T), 1)
    dist = (j - i).astype(jnp.float32)
    causal = j <= i
    return jnp.where(causal[None, :, :],
                     dist[None, :, :] * slopes[:, None, None],
                     jnp.float32(NEG_BIG))


def init_params(key, vocab, E, num_layers, num_heads, block_size, ffn_hidden=100):
    L, H = num_layers, num_heads
    hs = E // H
    ffn_pad = ((ffn_hidden + 127) // 128) * 128      # lane-align the FFN hidden dim
    v_pad = ((vocab + 127) // 128) * 128             # lane-align the logits output
    k = jax.random.split(key, 6)
    bf = jnp.bfloat16

    def nrm(kk, shape):
        return 0.02 * jax.random.normal(kk, shape, jnp.float32)

    # fused [Q | K | V] weight (head-major columns) with 1/sqrt(hs) folded into Q columns
    wqkv = nrm(k[1], (L, E, 3 * E))
    wqkv = wqkv.at[:, :, :E].multiply(float(hs) ** -0.5)

    w1 = jnp.zeros((L, E, ffn_pad), jnp.float32).at[:, :, :ffn_hidden].set(
        nrm(k[3], (L, E, ffn_hidden)))
    w2 = jnp.zeros((L, ffn_pad, E), jnp.float32).at[:, :ffn_hidden, :].set(
        nrm(k[4], (L, ffn_hidden, E)))
    w_out = jnp.zeros((E, v_pad), jnp.float32).at[:, :vocab].set(nrm(k[5], (E, vocab)))

    return {
        "embedding": nrm(k[0], (vocab, E)),
        # per-layer stacked weights (leading layer axis), bf16 matmul operands
        "wqkv": wqkv.astype(bf),
        "wo_h": nrm(k[2], (L, H, hs, E)).astype(bf),     # output proj split per head
        "bo": jnp.zeros((L, 1, E), jnp.float32),
        "w1": w1.astype(bf),
        "b1": jnp.zeros((L, 1, ffn_pad), jnp.float32),
        "w2": w2.astype(bf),
        "b2": jnp.zeros((L, 1, E), jnp.float32),
        "ln1_g": jnp.ones((L, 1, E), jnp.float32),
        "ln1_b": jnp.zeros((L, 1, E), jnp.float32),
        "ln2_g": jnp.ones((L, 1, E), jnp.float32),
        "ln2_b": jnp.zeros((L, 1, E), jnp.float32),
        # final LN + (lane-padded) vocab head
        "lnf_g": jnp.ones((1, E), jnp.float32),
        "lnf_b": jnp.zeros((1, E), jnp.float32),
        "w_out": w_out.astype(bf),
        "b_out": jnp.zeros((1, v_pad), jnp.float32),
        # precomputed ALiBi + causal additive bias
        "alibi_bias": make_alibi_bias(num_heads, block_size),
        "num_heads": num_heads,
        "vocab_size": vocab,
    }


def alibi_decoder_forward(params, tokens):
    """Matches AlibiDecoder.forward(x, y=None): returns (loss=None, attention_maps, logits).

    attention_maps = list (len num_heads) of (B, T, T) softmax maps from the LAST block,
    exactly as the PyTorch Sequential of Blocks propagates them.  Logits are also computed
    even though the PyTorch forward discards them when y is None.
    """
    H = params["num_heads"]
    V = params["vocab_size"]
    # Embedding lookup (gather) is plain-JAX glue.
    x = jnp.take(params["embedding"], tokens, axis=0)          # (B, T, E)
    logits_pad, attn = run_fused(x, params)
    logits = logits_pad[..., :V]                               # strip the lane padding
    attn_list = [attn[:, h, :, :] for h in range(H)]           # per-head (B, T, T)
    loss = None                                                # y is None
    return loss, attn_list, logits


if __name__ == "__main__":
    vocab_size = 64
    embedding_size = 32
    num_layers = 2
    block_size = 8       # == sequence length T (ALiBi bias built for block_size)
    num_heads = 4
    batch = 2

    key = jax.random.PRNGKey(0)
    pkey, tkey = jax.random.split(key)
    params = init_params(pkey, vocab_size, embedding_size, num_layers, num_heads, block_size)
    tokens = jax.random.randint(tkey, (batch, block_size), 0, vocab_size, dtype=jnp.int32)

    loss, attn_maps, logits = alibi_decoder_forward(params, tokens)
    jax.block_until_ready(logits)
    for a in attn_maps:
        jax.block_until_ready(a)

    # light sanity checks
    assert loss is None
    assert len(attn_maps) == num_heads
    assert attn_maps[0].shape == (batch, block_size, block_size)
    assert logits.shape == (batch, block_size, vocab_size)
    assert bool(jnp.all(jnp.isfinite(logits)))
    # softmax rows sum to ~1 (loose tol: approx EUP reciprocal is used for normalization)
    row_sums = jnp.sum(attn_maps[0], axis=-1)
    assert bool(jnp.allclose(row_sums, 1.0, atol=1e-2))
    # causality: no attention mass above the diagonal
    upper = jnp.triu(jnp.ones((block_size, block_size), jnp.float32), k=1).astype(bool)
    assert bool(jnp.all(jnp.where(upper[None], attn_maps[0], 0.0) < 1e-6))

    print("KERNEL_OK")
</pallas_src>

<mosaic_0001>
module attributes {stable_mosaic.version = 11 : i64} {
  func.func @fused_kernel(%arg0: i32, %arg1: memref<1x8x32xf32, #tpu.memory_space<vmem>>, %arg2: memref<4x8x8xf32, #tpu.memory_space<vmem>>, %arg3: memref<2x1x32xf32, #tpu.memory_space<vmem>>, %arg4: memref<2x1x32xf32, #tpu.memory_space<vmem>>, %arg5: memref<2x32x96xbf16, #tpu.memory_space<vmem>>, %arg6: memref<2x4x8x32xbf16, #tpu.memory_space<vmem>>, %arg7: memref<2x1x32xf32, #tpu.memory_space<vmem>>, %arg8: memref<2x1x32xf32, #tpu.memory_space<vmem>>, %arg9: memref<2x1x32xf32, #tpu.memory_space<vmem>>, %arg10: memref<2x32x128xbf16, #tpu.memory_space<vmem>>, %arg11: memref<2x1x128xf32, #tpu.memory_space<vmem>>, %arg12: memref<2x128x32xbf16, #tpu.memory_space<vmem>>, %arg13: memref<2x1x32xf32, #tpu.memory_space<vmem>>, %arg14: memref<1x32xf32, #tpu.memory_space<vmem>>, %arg15: memref<1x32xf32, #tpu.memory_space<vmem>>, %arg16: memref<32x128xbf16, #tpu.memory_space<vmem>>, %arg17: memref<1x128xf32, #tpu.memory_space<vmem>>, %arg18: memref<1x8x128xf32, #tpu.memory_space<vmem>>, %arg19: memref<1x4x8x8xf32, #tpu.memory_space<vmem>>) attributes {dimension_semantics = [#tpu.dimension_semantics<parallel>], iteration_bounds = array<i64: 2>, scalar_prefetch = 0 : i64, scratch_operands = 0 : i64, tpu.core_type = #tpu.core_type<tc>, window_params = [{transform_indices = @transform_0, window_bounds = array<i64: 1, 8, 32>}, {pipeline_mode = #tpu.pipeline_mode<synchronous>, transform_indices = @transform_1, window_bounds = array<i64: 4, 8, 8>}, {pipeline_mode = #tpu.pipeline_mode<synchronous>, transform_indices = @transform_2, window_bounds = array<i64: 2, 1, 32>}, {pipeline_mode = #tpu.pipeline_mode<synchronous>, transform_indices = @transform_3, window_bounds = array<i64: 2, 1, 32>}, {pipeline_mode = #tpu.pipeline_mode<synchronous>, transform_indices = @transform_4, window_bounds = array<i64: 2, 32, 96>}, {pipeline_mode = #tpu.pipeline_mode<synchronous>, transform_indices = @transform_5, window_bounds = array<i64: 2, 4, 8, 32>}, {pipeline_mode = #tpu.pipeline_mode<synchronous>, transform_indices = @transform_6, window_bounds = array<i64: 2, 1, 32>}, {pipeline_mode = #tpu.pipeline_mode<synchronous>, transform_indices = @transform_7, window_bounds = array<i64: 2, 1, 32>}, {pipeline_mode = #tpu.pipeline_mode<synchronous>, transform_indices = @transform_8, window_bounds = array<i64: 2, 1, 32>}, {pipeline_mode = #tpu.pipeline_mode<synchronous>, transform_indices = @transform_9, window_bounds = array<i64: 2, 32, 128>}, {pipeline_mode = #tpu.pipeline_mode<synchronous>, transform_indices = @transform_10, window_bounds = array<i64: 2, 1, 128>}, {pipeline_mode = #tpu.pipeline_mode<synchronous>, transform_indices = @transform_11, window_bounds = array<i64: 2, 128, 32>}, {pipeline_mode = #tpu.pipeline_mode<synchronous>, transform_indices = @transform_12, window_bounds = array<i64: 2, 1, 32>}, {pipeline_mode = #tpu.pipeline_mode<synchronous>, transform_indices = @transform_13, window_bounds = array<i64: 1, 32>}, {pipeline_mode = #tpu.pipeline_mode<synchronous>, transform_indices = @transform_14, window_bounds = array<i64: 1, 32>}, {pipeline_mode = #tpu.pipeline_mode<synchronous>, transform_indices = @transform_15, window_bounds = array<i64: 32, 128>}, {pipeline_mode = #tpu.pipeline_mode<synchronous>, transform_indices = @transform_16, window_bounds = array<i64: 1, 128>}, {transform_indices = @transform_17, window_bounds = array<i64: 1, 8, 128>}, {transform_indices = @transform_18, window_bounds = array<i64: 1, 4, 8, 8>}]} {
    %c0 = arith.constant 0 : index
    %c0_0 = arith.constant 0 : index
    %c0_1 = arith.constant 0 : index
    %0 = vector.load %arg1[%c0, %c0_0, %c0_1] : memref<1x8x32xf32, #tpu.memory_space<vmem>>, vector<1x8x32xf32>
    %1 = vector.shape_cast %0 : vector<1x8x32xf32> to vector<8x32xf32>
    %c0_2 = arith.constant 0 : index
    %c0_3 = arith.constant 0 : index
    %c0_4 = arith.constant 0 : index
    %2 = vector.load %arg2[%c0_2, %c0_3, %c0_4] : memref<4x8x8xf32, #tpu.memory_space<vmem>>, vector<4x8x8xf32>
    %c0_5 = arith.constant 0 : index
    %c0_6 = arith.constant 0 : index
    %c0_7 = arith.constant 0 : index
    %3 = vector.load %arg3[%c0_5, %c0_6, %c0_7] : memref<2x1x32xf32, #tpu.memory_space<vmem>>, vector<1x1x32xf32>
    %4 = vector.shape_cast %3 : vector<1x1x32xf32> to vector<1x32xf32>
    %c0_8 = arith.constant 0 : index
    %c0_9 = arith.constant 0 : index
    %c0_10 = arith.constant 0 : index
    %5 = vector.load %arg4[%c0_8, %c0_9, %c0_10] : memref<2x1x32xf32, #tpu.memory_space<vmem>>, vector<1x1x32xf32>
    %6 = vector.shape_cast %5 : vector<1x1x32xf32> to vector<1x32xf32>
    %cst = arith.constant dense<0.000000e+00> : vector<8xf32>
    %7 = vector.multi_reduction <add>, %1, %cst [1] : vector<8x32xf32> to vector<8xf32>
    %8 = vector.shape_cast %7 : vector<8xf32> to vector<8x1xf32>
    %cst_11 = arith.constant 3.200000e+01 : f32
    %9 = vector.broadcast %cst_11 : f32 to vector<8x1xf32>
    %10 = arith.divf %8, %9 : vector<8x1xf32>
    %11 = vector.broadcast %10 : vector<8x1xf32> to vector<8x32xf32>
    %12 = arith.subf %1, %11 : vector<8x32xf32>
    %13 = arith.mulf %12, %12 : vector<8x32xf32>
    %cst_12 = arith.constant dense<0.000000e+00> : vector<8xf32>
    %14 = vector.multi_reduction <add>, %13, %cst_12 [1] : vector<8x32xf32> to vector<8xf32>
    %15 = vector.shape_cast %14 : vector<8xf32> to vector<8x1xf32>
    %cst_13 = arith.constant 3.200000e+01 : f32
    %16 = vector.broadcast %cst_13 : f32 to vector<8x1xf32>
    %17 = arith.divf %15, %16 : vector<8x1xf32>
    %18 = vector.broadcast %10 : vector<8x1xf32> to vector<8x32xf32>
    %19 = arith.subf %1, %18 : vector<8x32xf32>
    %cst_14 = arith.constant 9.99999974E-6 : f32
    %20 = vector.broadcast %cst_14 : f32 to vector<8x1xf32>
    %21 = arith.addf %17, %20 : vector<8x1xf32>
    %22 = math.rsqrt %21 : vector<8x1xf32>
    %23 = vector.broadcast %22 : vector<8x1xf32> to vector<8x32xf32>
    %24 = arith.mulf %19, %23 : vector<8x32xf32>
    %25 = vector.broadcast %4 : vector<1x32xf32> to vector<8x32xf32>
    %26 = arith.mulf %24, %25 : vector<8x32xf32>
    %27 = vector.broadcast %6 : vector<1x32xf32> to vector<8x32xf32>
    %28 = arith.addf %26, %27 : vector<8x32xf32>
    %29 = arith.truncf %28 : vector<8x32xf32> to vector<8x32xbf16>
    %c0_15 = arith.constant 0 : index
    %c0_16 = arith.constant 0 : index
    %c0_17 = arith.constant 0 : index
    %30 = vector.load %arg5[%c0_15, %c0_16, %c0_17] : memref<2x32x96xbf16, #tpu.memory_space<vmem>>, vector<1x32x96xbf16>
    %31 = vector.shape_cast %30 : vector<1x32x96xbf16> to vector<32x96xbf16>
    %cst_18 = arith.constant dense<0.000000e+00> : vector<8x96xf32>
    %32 = tpu.matmul %29, %31, %cst_18 {dimension_numbers = #tpu.dot_dimension_numbers<[1], [0], [0], [1], [0, 0, 1, 1], [], []>} : vector<8x32xbf16>, vector<32x96xbf16>, vector<8x96xf32> -> vector<8x96xf32>
    %33 = arith.truncf %32 : vector<8x96xf32> to vector<8x96xbf16>
    %34 = vector.extract_strided_slice %33 {offsets = [0, 0], sizes = [8, 8], strides = [1, 1]} : vector<8x96xbf16> to vector<8x8xbf16>
    %35 = vector.extract_strided_slice %33 {offsets = [0, 8], sizes = [8, 8], strides = [1, 1]} : vector<8x96xbf16> to vector<8x8xbf16>
    %36 = vector.extract_strided_slice %33 {offsets = [0, 16], sizes = [8, 8], strides = [1, 1]} : vector<8x96xbf16> to vector<8x8xbf16>
    %37 = vector.extract_strided_slice %33 {offsets = [0, 24], sizes = [8, 8], strides = [1, 1]} : vector<8x96xbf16> to vector<8x8xbf16>
    %38 = vector.shape_cast %34 : vector<8x8xbf16> to vector<1x8x8xbf16>
    %39 = vector.shape_cast %35 : vector<8x8xbf16> to vector<1x8x8xbf16>
    %40 = vector.shape_cast %36 : vector<8x8xbf16> to vector<1x8x8xbf16>
    %41 = vector.shape_cast %37 : vector<8x8xbf16> to vector<1x8x8xbf16>
    %42 = tpu.concatenate %38, %39, %40, %41 in 0 : vector<1x8x8xbf16>, vector<1x8x8xbf16>, vector<1x8x8xbf16>, vector<1x8x8xbf16> -> vector<4x8x8xbf16>
    %43 = vector.extract_strided_slice %33 {offsets = [0, 32], sizes = [8, 8], strides = [1, 1]} : vector<8x96xbf16> to vector<8x8xbf16>
    %44 = vector.extract_strided_slice %33 {offsets = [0, 40], sizes = [8, 8], strides = [1, 1]} : vector<8x96xbf16> to vector<8x8xbf16>
    %45 = vector.extract_strided_slice %33 {offsets = [0, 48], sizes = [8, 8], strides = [1, 1]} : vector<8x96xbf16> to vector<8x8xbf16>
    %46 = vector.extract_strided_slice %33 {offsets = [0, 56], sizes = [8, 8], strides = [1, 1]} : vector<8x96xbf16> to vector<8x8xbf16>
    %47 = vector.shape_cast %43 : vector<8x8xbf16> to vector<1x8x8xbf16>
    %48 = vector.shape_cast %44 : vector<8x8xbf16> to vector<1x8x8xbf16>
    %49 = vector.shape_cast %45 : vector<8x8xbf16> to vector<1x8x8xbf16>
    %50 = vector.shape_cast %46 : vector<8x8xbf16> to vector<1x8x8xbf16>
    %51 = tpu.concatenate %47, %48, %49, %50 in 0 : vector<1x8x8xbf16>, vector<1x8x8xbf16>, vector<1x8x8xbf16>, vector<1x8x8xbf16> -> vector<4x8x8xbf16>
    %52 = vector.extract_strided_slice %33 {offsets = [0, 64], sizes = [8, 8], strides = [1, 1]} : vector<8x96xbf16> to vector<8x8xbf16>
    %53 = vector.extract_strided_slice %33 {offsets = [0, 72], sizes = [8, 8], strides = [1, 1]} : vector<8x96xbf16> to vector<8x8xbf16>
    %54 = vector.extract_strided_slice %33 {offsets = [0, 80], sizes = [8, 8], strides = [1, 1]} : vector<8x96xbf16> to vector<8x8xbf16>
    %55 = vector.extract_strided_slice %33 {offsets = [0, 88], sizes = [8, 8], strides = [1, 1]} : vector<8x96xbf16> to vector<8x8xbf16>
    %56 = vector.shape_cast %52 : vector<8x8xbf16> to vector<1x8x8xbf16>
    %57 = vector.shape_cast %53 : vector<8x8xbf16> to vector<1x8x8xbf16>
    %58 = vector.shape_cast %54 : vector<8x8xbf16> to vector<1x8x8xbf16>
    %59 = vector.shape_cast %55 : vector<8x8xbf16> to vector<1x8x8xbf16>
    %60 = tpu.concatenate %56, %57, %58, %59 in 0 : vector<1x8x8xbf16>, vector<1x8x8xbf16>, vector<1x8x8xbf16>, vector<1x8x8xbf16> -> vector<4x8x8xbf16>
    "tpu.trace_start"() <{level = 10 : i32, message = "hqd,hkd->hqk"}> : () -> ()
    %cst_19 = arith.constant dense<0.000000e+00> : vector<4x8x8xf32>
    %61 = tpu.matmul %42, %51, %cst_19 {dimension_numbers = #tpu.dot_dimension_numbers<[2], [2], [1], [1], [0, 0, 0, 1, 1, 1], [0], [0]>} : vector<4x8x8xbf16>, vector<4x8x8xbf16>, vector<4x8x8xf32> -> vector<4x8x8xf32>
    "tpu.trace_stop"() : () -> ()
    %62 = arith.addf %61, %2 : vector<4x8x8xf32>
    %cst_20 = arith.constant dense<0xFF800000> : vector<4x8xf32>
    %63 = vector.multi_reduction <maximumf>, %62, %cst_20 [2] : vector<4x8x8xf32> to vector<4x8xf32>
    %64 = vector.shape_cast %63 : vector<4x8xf32> to vector<4x8x1xf32>
    %65 = vector.broadcast %64 : vector<4x8x1xf32> to vector<4x8x8xf32>
    %66 = arith.subf %62, %65 : vector<4x8x8xf32>
    %67 = math.exp %66 : vector<4x8x8xf32>
    %cst_21 = arith.constant dense<0.000000e+00> : vector<4x8xf32>
    %68 = vector.multi_reduction <add>, %67, %cst_21 [2] : vector<4x8x8xf32> to vector<4x8xf32>
    %69 = vector.shape_cast %68 : vector<4x8xf32> to vector<4x8x1xf32>
    %70 = tpu.reciprocal %69 {approx = true} : vector<4x8x1xf32> -> vector<4x8x1xf32>
    %71 = vector.broadcast %70 : vector<4x8x1xf32> to vector<4x8x8xf32>
    %72 = arith.mulf %67, %71 : vector<4x8x8xf32>
    %73 = arith.truncf %72 : vector<4x8x8xf32> to vector<4x8x8xbf16>
    "tpu.trace_start"() <{level = 10 : i32, message = "hqk,hkd->hqd"}> : () -> ()
    %cst_22 = arith.constant dense<0.000000e+00> : vector<4x8x8xf32>
    %74 = tpu.matmul %73, %60, %cst_22 {dimension_numbers = #tpu.dot_dimension_numbers<[2], [1], [1], [2], [0, 0, 0, 1, 1, 2], [0], [0]>} : vector<4x8x8xbf16>, vector<4x8x8xbf16>, vector<4x8x8xf32> -> vector<4x8x8xf32>
    "tpu.trace_stop"() : () -> ()
    %75 = arith.truncf %74 : vector<4x8x8xf32> to vector<4x8x8xbf16>
    %c0_23 = arith.constant 0 : index
    %c0_24 = arith.constant 0 : index
    %c0_25 = arith.constant 0 : index
    %c0_26 = arith.constant 0 : index
    %76 = vector.load %arg6[%c0_23, %c0_24, %c0_25, %c0_26] : memref<2x4x8x32xbf16, #tpu.memory_space<vmem>>, vector<1x4x8x32xbf16>
    %77 = vector.shape_cast %76 : vector<1x4x8x32xbf16> to vector<4x8x32xbf16>
    "tpu.trace_start"() <{level = 10 : i32, message = "hqd,hde->hqe"}> : () -> ()
    %cst_27 = arith.constant dense<0.000000e+00> : vector<4x8x32xf32>
    %78 = tpu.matmul %75, %77, %cst_27 {dimension_numbers = #tpu.dot_dimension_numbers<[2], [1], [1], [2], [0, 0, 0, 1, 1, 2], [0], [0]>} : vector<4x8x8xbf16>, vector<4x8x32xbf16>, vector<4x8x32xf32> -> vector<4x8x32xf32>
    "tpu.trace_stop"() : () -> ()
    %cst_28 = arith.constant dense<0.000000e+00> : vector<8x32xf32>
    %79 = vector.multi_reduction <add>, %78, %cst_28 [0] : vector<4x8x32xf32> to vector<8x32xf32>
    %80 = arith.addf %1, %79 : vector<8x32xf32>
    %c0_29 = arith.constant 0 : index
    %c0_30 = arith.constant 0 : index
    %c0_31 = arith.constant 0 : index
    %81 = vector.load %arg7[%c0_29, %c0_30, %c0_31] : memref<2x1x32xf32, #tpu.memory_space<vmem>>, vector<1x1x32xf32>
    %82 = vector.shape_cast %81 : vector<1x1x32xf32> to vector<1x32xf32>
    %83 = vector.broadcast %82 : vector<1x32xf32> to vector<8x32xf32>
    %84 = arith.addf %80, %83 : vector<8x32xf32>
    %c0_32 = arith.constant 0 : index
    %c0_33 = arith.constant 0 : index
    %c0_34 = arith.constant 0 : index
    %85 = vector.load %arg8[%c0_32, %c0_33, %c0_34] : memref<2x1x32xf32, #tpu.memory_space<vmem>>, vector<1x1x32xf32>
    %86 = vector.shape_cast %85 : vector<1x1x32xf32> to vector<1x32xf32>
    %c0_35 = arith.constant 0 : index
    %c0_36 = arith.constant 0 : index
    %c0_37 = arith.constant 0 : index
    %87 = vector.load %arg9[%c0_35, %c0_36, %c0_37] : memref<2x1x32xf32, #tpu.memory_space<vmem>>, vector<1x1x32xf32>
    %88 = vector.shape_cast %87 : vector<1x1x32xf32> to vector<1x32xf32>
    %cst_38 = arith.constant dense<0.000000e+00> : vector<8xf32>
    %89 = vector.multi_reduction <add>, %84, %cst_38 [1] : vector<8x32xf32> to vector<8xf32>
    %90 = vector.shape_cast %89 : vector<8xf32> to vector<8x1xf32>
    %cst_39 = arith.constant 3.200000e+01 : f32
    %91 = vector.broadcast %cst_39 : f32 to vector<8x1xf32>
    %92 = arith.divf %90, %91 : vector<8x1xf32>
    %93 = vector.broadcast %92 : vector<8x1xf32> to vector<8x32xf32>
    %94 = arith.subf %84, %93 : vector<8x32xf32>
    %95 = arith.mulf %94, %94 : vector<8x32xf32>
    %cst_40 = arith.constant dense<0.000000e+00> : vector<8xf32>
    %96 = vector.multi_reduction <add>, %95, %cst_40 [1] : vector<8x32xf32> to vector<8xf32>
    %97 = vector.shape_cast %96 : vector<8xf32> to vector<8x1xf32>
    %cst_41 = arith.constant 3.200000e+01 : f32
    %98 = vector.broadcast %cst_41 : f32 to vector<8x1xf32>
    %99 = arith.divf %97, %98 : vector<8x1xf32>
    %100 = vector.broadcast %92 : vector<8x1xf32> to vector<8x32xf32>
    %101 = arith.subf %84, %100 : vector<8x32xf32>
    %cst_42 = arith.constant 9.99999974E-6 : f32
    %102 = vector.broadcast %cst_42 : f32 to vector<8x1xf32>
    %103 = arith.addf %99, %102 : vector<8x1xf32>
    %104 = math.rsqrt %103 : vector<8x1xf32>
    %105 = vector.broadcast %104 : vector<8x1xf32> to vector<8x32xf32>
    %106 = arith.mulf %101, %105 : vector<8x32xf32>
    %107 = vector.broadcast %86 : vector<1x32xf32> to vector<8x32xf32>
    %108 = arith.mulf %106, %107 : vector<8x32xf32>
    %109 = vector.broadcast %88 : vector<1x32xf32> to vector<8x32xf32>
    %110 = arith.addf %108, %109 : vector<8x32xf32>
    %111 = arith.truncf %110 : vector<8x32xf32> to vector<8x32xbf16>
    %c0_43 = arith.constant 0 : index
    %c0_44 = arith.constant 0 : index
    %c0_45 = arith.constant 0 : index
    %112 = vector.load %arg10[%c0_43, %c0_44, %c0_45] : memref<2x32x128xbf16, #tpu.memory_space<vmem>>, vector<1x32x128xbf16>
    %113 = vector.shape_cast %112 : vector<1x32x128xbf16> to vector<32x128xbf16>
    %cst_46 = arith.constant dense<0.000000e+00> : vector<8x128xf32>
    %114 = tpu.matmul %111, %113, %cst_46 {dimension_numbers = #tpu.dot_dimension_numbers<[1], [0], [0], [1], [0, 0, 1, 1], [], []>} : vector<8x32xbf16>, vector<32x128xbf16>, vector<8x128xf32> -> vector<8x128xf32>
    %c0_47 = arith.constant 0 : index
    %c0_48 = arith.constant 0 : index
    %c0_49 = arith.constant 0 : index
    %115 = vector.load %arg11[%c0_47, %c0_48, %c0_49] : memref<2x1x128xf32, #tpu.memory_space<vmem>>, vector<1x1x128xf32>
    %116 = vector.shape_cast %115 : vector<1x1x128xf32> to vector<1x128xf32>
    %117 = vector.broadcast %116 : vector<1x128xf32> to vector<8x128xf32>
    %118 = arith.addf %114, %117 : vector<8x128xf32>
    %cst_50 = arith.constant 0.000000e+00 : f32
    %119 = vector.broadcast %cst_50 : f32 to vector<8x128xf32>
    %120 = arith.maximumf %118, %119 : vector<8x128xf32>
    %121 = arith.truncf %120 : vector<8x128xf32> to vector<8x128xbf16>
    %c0_51 = arith.constant 0 : index
    %c0_52 = arith.constant 0 : index
    %c0_53 = arith.constant 0 : index
    %122 = vector.load %arg12[%c0_51, %c0_52, %c0_53] : memref<2x128x32xbf16, #tpu.memory_space<vmem>>, vector<1x128x32xbf16>
    %123 = vector.shape_cast %122 : vector<1x128x32xbf16> to vector<128x32xbf16>
    %cst_54 = arith.constant dense<0.000000e+00> : vector<8x32xf32>
    %124 = tpu.matmul %121, %123, %cst_54 {dimension_numbers = #tpu.dot_dimension_numbers<[1], [0], [0], [1], [0, 0, 1, 1], [], []>} : vector<8x128xbf16>, vector<128x32xbf16>, vector<8x32xf32> -> vector<8x32xf32>
    %125 = arith.addf %84, %124 : vector<8x32xf32>
    %c0_55 = arith.constant 0 : index
    %c0_56 = arith.constant 0 : index
    %c0_57 = arith.constant 0 : index
    %126 = vector.load %arg13[%c0_55, %c0_56, %c0_57] : memref<2x1x32xf32, #tpu.memory_space<vmem>>, vector<1x1x32xf32>
    %127 = vector.shape_cast %126 : vector<1x1x32xf32> to vector<1x32xf32>
    %128 = vector.broadcast %127 : vector<1x32xf32> to vector<8x32xf32>
    %129 = arith.addf %125, %128 : vector<8x32xf32>
    %c1 = arith.constant 1 : index
    %c0_58 = arith.constant 0 : index
    %c0_59 = arith.constant 0 : index
    %130 = vector.load %arg3[%c1, %c0_58, %c0_59] : memref<2x1x32xf32, #tpu.memory_space<vmem>>, vector<1x1x32xf32>
    %131 = vector.shape_cast %130 : vector<1x1x32xf32> to vector<1x32xf32>
    %c1_60 = arith.constant 1 : index
    %c0_61 = arith.constant 0 : index
    %c0_62 = arith.constant 0 : index
    %132 = vector.load %arg4[%c1_60, %c0_61, %c0_62] : memref<2x1x32xf32, #tpu.memory_space<vmem>>, vector<1x1x32xf32>
    %133 = vector.shape_cast %132 : vector<1x1x32xf32> to vector<1x32xf32>
    %cst_63 = arith.constant dense<0.000000e+00> : vector<8xf32>
    %134 = vector.multi_reduction <add>, %129, %cst_63 [1] : vector<8x32xf32> to vector<8xf32>
    %135 = vector.shape_cast %134 : vector<8xf32> to vector<8x1xf32>
    %cst_64 = arith.constant 3.200000e+01 : f32
    %136 = vector.broadcast %cst_64 : f32 to vector<8x1xf32>
    %137 = arith.divf %135, %136 : vector<8x1xf32>
    %138 = vector.broadcast %137 : vector<8x1xf32> to vector<8x32xf32>
    %139 = arith.subf %129, %138 : vector<8x32xf32>
    %140 = arith.mulf %139, %139 : vector<8x32xf32>
    %cst_65 = arith.constant dense<0.000000e+00> : vector<8xf32>
    %141 = vector.multi_reduction <add>, %140, %cst_65 [1] : vector<8x32xf32> to vector<8xf32>
    %142 = vector.shape_cast %141 : vector<8xf32> to vector<8x1xf32>
    %cst_66 = arith.constant 3.200000e+01 : f32
    %143 = vector.broadcast %cst_66 : f32 to vector<8x1xf32>
    %144 = arith.divf %142, %143 : vector<8x1xf32>
    %145 = vector.broadcast %137 : vector<8x1xf32> to vector<8x32xf32>
    %146 = arith.subf %129, %145 : vector<8x32xf32>
    %cst_67 = arith.constant 9.99999974E-6 : f32
    %147 = vector.broadcast %cst_67 : f32 to vector<8x1xf32>
    %148 = arith.addf %144, %147 : vector<8x1xf32>
    %149 = math.rsqrt %148 : vector<8x1xf32>
    %150 = vector.broadcast %149 : vector<8x1xf32> to vector<8x32xf32>
    %151 = arith.mulf %146, %150 : vector<8x32xf32>
    %152 = vector.broadcast %131 : vector<1x32xf32> to vector<8x32xf32>
    %153 = arith.mulf %151, %152 : vector<8x32xf32>
    %154 = vector.broadcast %133 : vector<1x32xf32> to vector<8x32xf32>
    %155 = arith.addf %153, %154 : vector<8x32xf32>
    %156 = arith.truncf %155 : vector<8x32xf32> to vector<8x32xbf16>
    %c1_68 = arith.constant 1 : index
    %c0_69 = arith.constant 0 : index
    %c0_70 = arith.constant 0 : index
    %157 = vector.load %arg5[%c1_68, %c0_69, %c0_70] : memref<2x32x96xbf16, #tpu.memory_space<vmem>>, vector<1x32x96xbf16>
    %158 = vector.shape_cast %157 : vector<1x32x96xbf16> to vector<32x96xbf16>
    %cst_71 = arith.constant dense<0.000000e+00> : vector<8x96xf32>
    %159 = tpu.matmul %156, %158, %cst_71 {dimension_numbers = #tpu.dot_dimension_numbers<[1], [0], [0], [1], [0, 0, 1, 1], [], []>} : vector<8x32xbf16>, vector<32x96xbf16>, vector<8x96xf32> -> vector<8x96xf32>
    %160 = arith.truncf %159 : vector<8x96xf32> to vector<8x96xbf16>
    %161 = vector.extract_strided_slice %160 {offsets = [0, 0], sizes = [8, 8], strides = [1, 1]} : vector<8x96xbf16> to vector<8x8xbf16>
    %162 = vector.extract_strided_slice %160 {offsets = [0, 8], sizes = [8, 8], strides = [1, 1]} : vector<8x96xbf16> to vector<8x8xbf16>
    %163 = vector.extract_strided_slice %160 {offsets = [0, 16], sizes = [8, 8], strides = [1, 1]} : vector<8x96xbf16> to vector<8x8xbf16>
    %164 = vector.extract_strided_slice %160 {offsets = [0, 24], sizes = [8, 8], strides = [1, 1]} : vector<8x96xbf16> to vector<8x8xbf16>
    %165 = vector.shape_cast %161 : vector<8x8xbf16> to vector<1x8x8xbf16>
    %166 = vector.shape_cast %162 : vector<8x8xbf16> to vector<1x8x8xbf16>
    %167 = vector.shape_cast %163 : vector<8x8xbf16> to vector<1x8x8xbf16>
    %168 = vector.shape_cast %164 : vector<8x8xbf16> to vector<1x8x8xbf16>
    %169 = tpu.concatenate %165, %166, %167, %168 in 0 : vector<1x8x8xbf16>, vector<1x8x8xbf16>, vector<1x8x8xbf16>, vector<1x8x8xbf16> -> vector<4x8x8xbf16>
    %170 = vector.extract_strided_slice %160 {offsets = [0, 32], sizes = [8, 8], strides = [1, 1]} : vector<8x96xbf16> to vector<8x8xbf16>
    %171 = vector.extract_strided_slice %160 {offsets = [0, 40], sizes = [8, 8], strides = [1, 1]} : vector<8x96xbf16> to vector<8x8xbf16>
    %172 = vector.extract_strided_slice %160 {offsets = [0, 48], sizes = [8, 8], strides = [1, 1]} : vector<8x96xbf16> to vector<8x8xbf16>
    %173 = vector.extract_strided_slice %160 {offsets = [0, 56], sizes = [8, 8], strides = [1, 1]} : vector<8x96xbf16> to vector<8x8xbf16>
    %174 = vector.shape_cast %170 : vector<8x8xbf16> to vector<1x8x8xbf16>
    %175 = vector.shape_cast %171 : vector<8x8xbf16> to vector<1x8x8xbf16>
    %176 = vector.shape_cast %172 : vector<8x8xbf16> to vector<1x8x8xbf16>
    %177 = vector.shape_cast %173 : vector<8x8xbf16> to vector<1x8x8xbf16>
    %178 = tpu.concatenate %174, %175, %176, %177 in 0 : vector<1x8x8xbf16>, vector<1x8x8xbf16>, vector<1x8x8xbf16>, vector<1x8x8xbf16> -> vector<4x8x8xbf16>
    %179 = vector.extract_strided_slice %160 {offsets = [0, 64], sizes = [8, 8], strides = [1, 1]} : vector<8x96xbf16> to vector<8x8xbf16>
    %180 = vector.extract_strided_slice %160 {offsets = [0, 72], sizes = [8, 8], strides = [1, 1]} : vector<8x96xbf16> to vector<8x8xbf16>
    %181 = vector.extract_strided_slice %160 {offsets = [0, 80], sizes = [8, 8], strides = [1, 1]} : vector<8x96xbf16> to vector<8x8xbf16>
    %182 = vector.extract_strided_slice %160 {offsets = [0, 88], sizes = [8, 8], strides = [1, 1]} : vector<8x96xbf16> to vector<8x8xbf16>
    %183 = vector.shape_cast %179 : vector<8x8xbf16> to vector<1x8x8xbf16>
    %184 = vector.shape_cast %180 : vector<8x8xbf16> to vector<1x8x8xbf16>
    %185 = vector.shape_cast %181 : vector<8x8xbf16> to vector<1x8x8xbf16>
    %186 = vector.shape_cast %182 : vector<8x8xbf16> to vector<1x8x8xbf16>
    %187 = tpu.concatenate %183, %184, %185, %186 in 0 : vector<1x8x8xbf16>, vector<1x8x8xbf16>, vector<1x8x8xbf16>, vector<1x8x8xbf16> -> vector<4x8x8xbf16>
    "tpu.trace_start"() <{level = 10 : i32, message = "hqd,hkd->hqk"}> : () -> ()
    %cst_72 = arith.constant dense<0.000000e+00> : vector<4x8x8xf32>
    %188 = tpu.matmul %169, %178, %cst_72 {dimension_numbers = #tpu.dot_dimension_numbers<[2], [2], [1], [1], [0, 0, 0, 1, 1, 1], [0], [0]>} : vector<4x8x8xbf16>, vector<4x8x8xbf16>, vector<4x8x8xf32> -> vector<4x8x8xf32>
    "tpu.trace_stop"() : () -> ()
    %189 = arith.addf %188, %2 : vector<4x8x8xf32>
    %cst_73 = arith.constant dense<0xFF800000> : vector<4x8xf32>
    %190 = vector.multi_reduction <maximumf>, %189, %cst_73 [2] : vector<4x8x8xf32> to vector<4x8xf32>
    %191 = vector.shape_cast %190 : vector<4x8xf32> to vector<4x8x1xf32>
    %192 = vector.broadcast %191 : vector<4x8x1xf32> to vector<4x8x8xf32>
    %193 = arith.subf %189, %192 : vector<4x8x8xf32>
    %194 = math.exp %193 : vector<4x8x8xf32>
    %cst_74 = arith.constant dense<0.000000e+00> : vector<4x8xf32>
    %195 = vector.multi_reduction <add>, %194, %cst_74 [2] : vector<4x8x8xf32> to vector<4x8xf32>
    %196 = vector.shape_cast %195 : vector<4x8xf32> to vector<4x8x1xf32>
    %197 = tpu.reciprocal %196 {approx = true} : vector<4x8x1xf32> -> vector<4x8x1xf32>
    %198 = vector.broadcast %197 : vector<4x8x1xf32> to vector<4x8x8xf32>
    %199 = arith.mulf %194, %198 : vector<4x8x8xf32>
    %c0_75 = arith.constant 0 : index
    %c0_76 = arith.constant 0 : index
    %c0_77 = arith.constant 0 : index
    %c0_78 = arith.constant 0 : index
    %200 = vector.load %arg19[%c0_75, %c0_76, %c0_77, %c0_78] : memref<1x4x8x8xf32, #tpu.memory_space<vmem>>, vector<1x4x8x8xf32>
    %201 = vector.shape_cast %200 : vector<1x4x8x8xf32> to vector<4x8x8xf32>
    %202 = vector.shape_cast %199 : vector<4x8x8xf32> to vector<1x4x8x8xf32>
    tpu.vector_store %arg19[%c0_75, %c0_76, %c0_77, %c0_78], %202 {strides = array<i32>} : memref<1x4x8x8xf32, #tpu.memory_space<vmem>>, vector<1x4x8x8xf32>,
    %203 = arith.truncf %199 : vector<4x8x8xf32> to vector<4x8x8xbf16>
    "tpu.trace_start"() <{level = 10 : i32, message = "hqk,hkd->hqd"}> : () -> ()
    %cst_79 = arith.constant dense<0.000000e+00> : vector<4x8x8xf32>
    %204 = tpu.matmul %203, %187, %cst_79 {dimension_numbers = #tpu.dot_dimension_numbers<[2], [1], [1], [2], [0, 0, 0, 1, 1, 2], [0], [0]>} : vector<4x8x8xbf16>, vector<4x8x8xbf16>, vector<4x8x8xf32> -> vector<4x8x8xf32>
    "tpu.trace_stop"() : () -> ()
    %205 = arith.truncf %204 : vector<4x8x8xf32> to vector<4x8x8xbf16>
    %c1_80 = arith.constant 1 : index
    %c0_81 = arith.constant 0 : index
    %c0_82 = arith.constant 0 : index
    %c0_83 = arith.constant 0 : index
    %206 = vector.load %arg6[%c1_80, %c0_81, %c0_82, %c0_83] : memref<2x4x8x32xbf16, #tpu.memory_space<vmem>>, vector<1x4x8x32xbf16>
    %207 = vector.shape_cast %206 : vector<1x4x8x32xbf16> to vector<4x8x32xbf16>
    "tpu.trace_start"() <{level = 10 : i32, message = "hqd,hde->hqe"}> : () -> ()
    %cst_84 = arith.constant dense<0.000000e+00> : vector<4x8x32xf32>
    %208 = tpu.matmul %205, %207, %cst_84 {dimension_numbers = #tpu.dot_dimension_numbers<[2], [1], [1], [2], [0, 0, 0, 1, 1, 2], [0], [0]>} : vector<4x8x8xbf16>, vector<4x8x32xbf16>, vector<4x8x32xf32> -> vector<4x8x32xf32>
    "tpu.trace_stop"() : () -> ()
    %cst_85 = arith.constant dense<0.000000e+00> : vector<8x32xf32>
    %209 = vector.multi_reduction <add>, %208, %cst_85 [0] : vector<4x8x32xf32> to vector<8x32xf32>
    %210 = arith.addf %129, %209 : vector<8x32xf32>
    %c1_86 = arith.constant 1 : index
    %c0_87 = arith.constant 0 : index
    %c0_88 = arith.constant 0 : index
    %211 = vector.load %arg7[%c1_86, %c0_87, %c0_88] : memref<2x1x32xf32, #tpu.memory_space<vmem>>, vector<1x1x32xf32>
    %212 = vector.shape_cast %211 : vector<1x1x32xf32> to vector<1x32xf32>
    %213 = vector.broadcast %212 : vector<1x32xf32> to vector<8x32xf32>
    %214 = arith.addf %210, %213 : vector<8x32xf32>
    %c1_89 = arith.constant 1 : index
    %c0_90 = arith.constant 0 : index
    %c0_91 = arith.constant 0 : index
    %215 = vector.load %arg8[%c1_89, %c0_90, %c0_91] : memref<2x1x32xf32, #tpu.memory_space<vmem>>, vector<1x1x32xf32>
    %216 = vector.shape_cast %215 : vector<1x1x32xf32> to vector<1x32xf32>
    %c1_92 = arith.constant 1 : index
    %c0_93 = arith.constant 0 : index
    %c0_94 = arith.constant 0 : index
    %217 = vector.load %arg9[%c1_92, %c0_93, %c0_94] : memref<2x1x32xf32, #tpu.memory_space<vmem>>, vector<1x1x32xf32>
    %218 = vector.shape_cast %217 : vector<1x1x32xf32> to vector<1x32xf32>
    %cst_95 = arith.constant dense<0.000000e+00> : vector<8xf32>
    %219 = vector.multi_reduction <add>, %214, %cst_95 [1] : vector<8x32xf32> to vector<8xf32>
    %220 = vector.shape_cast %219 : vector<8xf32> to vector<8x1xf32>
    %cst_96 = arith.constant 3.200000e+01 : f32
    %221 = vector.broadcast %cst_96 : f32 to vector<8x1xf32>
    %222 = arith.divf %220, %221 : vector<8x1xf32>
    %223 = vector.broadcast %222 : vector<8x1xf32> to vector<8x32xf32>
    %224 = arith.subf %214, %223 : vector<8x32xf32>
    %225 = arith.mulf %224, %224 : vector<8x32xf32>
    %cst_97 = arith.constant dense<0.000000e+00> : vector<8xf32>
    %226 = vector.multi_reduction <add>, %225, %cst_97 [1] : vector<8x32xf32> to vector<8xf32>
    %227 = vector.shape_cast %226 : vector<8xf32> to vector<8x1xf32>
    %cst_98 = arith.constant 3.200000e+01 : f32
    %228 = vector.broadcast %cst_98 : f32 to vector<8x1xf32>
    %229 = arith.divf %227, %228 : vector<8x1xf32>
    %230 = vector.broadcast %222 : vector<8x1xf32> to vector<8x32xf32>
    %231 = arith.subf %214, %230 : vector<8x32xf32>
    %cst_99 = arith.constant 9.99999974E-6 : f32
    %232 = vector.broadcast %cst_99 : f32 to vector<8x1xf32>
    %233 = arith.addf %229, %232 : vector<8x1xf32>
    %234 = math.rsqrt %233 : vector<8x1xf32>
    %235 = vector.broadcast %234 : vector<8x1xf32> to vector<8x32xf32>
    %236 = arith.mulf %231, %235 : vector<8x32xf32>
    %237 = vector.broadcast %216 : vector<1x32xf32> to vector<8x32xf32>
    %238 = arith.mulf %236, %237 : vector<8x32xf32>
    %239 = vector.broadcast %218 : vector<1x32xf32> to vector<8x32xf32>
    %240 = arith.addf %238, %239 : vector<8x32xf32>
    %241 = arith.truncf %240 : vector<8x32xf32> to vector<8x32xbf16>
    %c1_100 = arith.constant 1 : index
    %c0_101 = arith.constant 0 : index
    %c0_102 = arith.constant 0 : index
    %242 = vector.load %arg10[%c1_100, %c0_101, %c0_102] : memref<2x32x128xbf16, #tpu.memory_space<vmem>>, vector<1x32x128xbf16>
    %243 = vector.shape_cast %242 : vector<1x32x128xbf16> to vector<32x128xbf16>
    %cst_103 = arith.constant dense<0.000000e+00> : vector<8x128xf32>
    %244 = tpu.matmul %241, %243, %cst_103 {dimension_numbers = #tpu.dot_dimension_numbers<[1], [0], [0], [1], [0, 0, 1, 1], [], []>} : vector<8x32xbf16>, vector<32x128xbf16>, vector<8x128xf32> -> vector<8x128xf32>
    %c1_104 = arith.constant 1 : index
    %c0_105 = arith.constant 0 : index
    %c0_106 = arith.constant 0 : index
    %245 = vector.load %arg11[%c1_104, %c0_105, %c0_106] : memref<2x1x128xf32, #tpu.memory_space<vmem>>, vector<1x1x128xf32>
    %246 = vector.shape_cast %245 : vector<1x1x128xf32> to vector<1x128xf32>
    %247 = vector.broadcast %246 : vector<1x128xf32> to vector<8x128xf32>
    %248 = arith.addf %244, %247 : vector<8x128xf32>
    %cst_107 = arith.constant 0.000000e+00 : f32
    %249 = vector.broadcast %cst_107 : f32 to vector<8x128xf32>
    %250 = arith.maximumf %248, %249 : vector<8x128xf32>
    %251 = arith.truncf %250 : vector<8x128xf32> to vector<8x128xbf16>
    %c1_108 = arith.constant 1 : index
    %c0_109 = arith.constant 0 : index
    %c0_110 = arith.constant 0 : index
    %252 = vector.load %arg12[%c1_108, %c0_109, %c0_110] : memref<2x128x32xbf16, #tpu.memory_space<vmem>>, vector<1x128x32xbf16>
    %253 = vector.shape_cast %252 : vector<1x128x32xbf16> to vector<128x32xbf16>
    %cst_111 = arith.constant dense<0.000000e+00> : vector<8x32xf32>
    %254 = tpu.matmul %251, %253, %cst_111 {dimension_numbers = #tpu.dot_dimension_numbers<[1], [0], [0], [1], [0, 0, 1, 1], [], []>} : vector<8x128xbf16>, vector<128x32xbf16>, vector<8x32xf32> -> vector<8x32xf32>
    %255 = arith.addf %214, %254 : vector<8x32xf32>
    %c1_112 = arith.constant 1 : index
    %c0_113 = arith.constant 0 : index
    %c0_114 = arith.constant 0 : index
    %256 = vector.load %arg13[%c1_112, %c0_113, %c0_114] : memref<2x1x32xf32, #tpu.memory_space<vmem>>, vector<1x1x32xf32>
    %257 = vector.shape_cast %256 : vector<1x1x32xf32> to vector<1x32xf32>
    %258 = vector.broadcast %257 : vector<1x32xf32> to vector<8x32xf32>
    %259 = arith.addf %255, %258 : vector<8x32xf32>
    %c0_115 = arith.constant 0 : index
    %c0_116 = arith.constant 0 : index
    %260 = vector.load %arg14[%c0_115, %c0_116] : memref<1x32xf32, #tpu.memory_space<vmem>>, vector<1x32xf32>
    %c0_117 = arith.constant 0 : index
    %c0_118 = arith.constant 0 : index
    %261 = vector.load %arg15[%c0_117, %c0_118] : memref<1x32xf32, #tpu.memory_space<vmem>>, vector<1x32xf32>
    %cst_119 = arith.constant dense<0.000000e+00> : vector<8xf32>
    %262 = vector.multi_reduction <add>, %259, %cst_119 [1] : vector<8x32xf32> to vector<8xf32>
    %263 = vector.shape_cast %262 : vector<8xf32> to vector<8x1xf32>
    %cst_120 = arith.constant 3.200000e+01 : f32
    %264 = vector.broadcast %cst_120 : f32 to vector<8x1xf32>
    %265 = arith.divf %263, %264 : vector<8x1xf32>
    %266 = vector.broadcast %265 : vector<8x1xf32> to vector<8x32xf32>
    %267 = arith.subf %259, %266 : vector<8x32xf32>
    %268 = arith.mulf %267, %267 : vector<8x32xf32>
    %cst_121 = arith.constant dense<0.000000e+00> : vector<8xf32>
    %269 = vector.multi_reduction <add>, %268, %cst_121 [1] : vector<8x32xf32> to vector<8xf32>
    %270 = vector.shape_cast %269 : vector<8xf32> to vector<8x1xf32>
    %cst_122 = arith.constant 3.200000e+01 : f32
    %271 = vector.broadcast %cst_122 : f32 to vector<8x1xf32>
    %272 = arith.divf %270, %271 : vector<8x1xf32>
    %273 = vector.broadcast %265 : vector<8x1xf32> to vector<8x32xf32>
    %274 = arith.subf %259, %273 : vector<8x32xf32>
    %cst_123 = arith.constant 9.99999974E-6 : f32
    %275 = vector.broadcast %cst_123 : f32 to vector<8x1xf32>
    %276 = arith.addf %272, %275 : vector<8x1xf32>
    %277 = math.rsqrt %276 : vector<8x1xf32>
    %278 = vector.broadcast %277 : vector<8x1xf32> to vector<8x32xf32>
    %279 = arith.mulf %274, %278 : vector<8x32xf32>
    %280 = vector.broadcast %260 : vector<1x32xf32> to vector<8x32xf32>
    %281 = arith.mulf %279, %280 : vector<8x32xf32>
    %282 = vector.broadcast %261 : vector<1x32xf32> to vector<8x32xf32>
    %283 = arith.addf %281, %282 : vector<8x32xf32>
    %284 = arith.truncf %283 : vector<8x32xf32> to vector<8x32xbf16>
    %c0_124 = arith.constant 0 : index
    %c0_125 = arith.constant 0 : index
    %285 = vector.load %arg16[%c0_124, %c0_125] : memref<32x128xbf16, #tpu.memory_space<vmem>>, vector<32x128xbf16>
    %cst_126 = arith.constant dense<0.000000e+00> : vector<8x128xf32>
    %286 = tpu.matmul %284, %285, %cst_126 {dimension_numbers = #tpu.dot_dimension_numbers<[1], [0], [0], [1], [0, 0, 1, 1], [], []>} : vector<8x32xbf16>, vector<32x128xbf16>, vector<8x128xf32> -> vector<8x128xf32>
    %c0_127 = arith.constant 0 : index
    %c0_128 = arith.constant 0 : index
    %287 = vector.load %arg17[%c0_127, %c0_128] : memref<1x128xf32, #tpu.memory_space<vmem>>, vector<1x128xf32>
    %288 = vector.broadcast %287 : vector<1x128xf32> to vector<8x128xf32>
    %289 = arith.addf %286, %288 : vector<8x128xf32>
    %c0_129 = arith.constant 0 : index
    %c0_130 = arith.constant 0 : index
    %c0_131 = arith.constant 0 : index
    %290 = vector.load %arg18[%c0_129, %c0_130, %c0_131] : memref<1x8x128xf32, #tpu.memory_space<vmem>>, vector<1x8x128xf32>
    %291 = vector.shape_cast %290 : vector<1x8x128xf32> to vector<8x128xf32>
    %292 = vector.shape_cast %289 : vector<8x128xf32> to vector<1x8x128xf32>
    tpu.vector_store %arg18[%c0_129, %c0_130, %c0_131], %292 {strides = array<i32>} : memref<1x8x128xf32, #tpu.memory_space<vmem>>, vector<1x8x128xf32>,
    return
  }
  func.func @transform_0(%arg0: i32) -> (i32, i32, i32) {
    %c0_i32 = arith.constant 0 : i32
    %c0_i32_0 = arith.constant 0 : i32
    %c0_i32_1 = arith.constant 0 : i32
    return %arg0, %c0_i32, %c0_i32_0 : i32, i32, i32
  }
  func.func @transform_1(%arg0: i32) -> (i32, i32, i32) {
    %c0_i32 = arith.constant 0 : i32
    %c0_i32_0 = arith.constant 0 : i32
    %c0_i32_1 = arith.constant 0 : i32
    %c0_i32_2 = arith.constant 0 : i32
    return %c0_i32, %c0_i32_0, %c0_i32_1 : i32, i32, i32
  }
  func.func @transform_2(%arg0: i32) -> (i32, i32, i32) {
    %c0_i32 = arith.constant 0 : i32
    %c0_i32_0 = arith.constant 0 : i32
    %c0_i32_1 = arith.constant 0 : i32
    %c0_i32_2 = arith.constant 0 : i32
    return %c0_i32, %c0_i32_0, %c0_i32_1 : i32, i32, i32
  }
  func.func @transform_3(%arg0: i32) -> (i32, i32, i32) {
    %c0_i32 = arith.constant 0 : i32
    %c0_i32_0 = arith.constant 0 : i32
    %c0_i32_1 = arith.constant 0 : i32
    %c0_i32_2 = arith.constant 0 : i32
    return %c0_i32, %c0_i32_0, %c0_i32_1 : i32, i32, i32
  }
  func.func @transform_4(%arg0: i32) -> (i32, i32, i32) {
    %c0_i32 = arith.constant 0 : i32
    %c0_i32_0 = arith.constant 0 : i32
    %c0_i32_1 = arith.constant 0 : i32
    %c0_i32_2 = arith.constant 0 : i32
    return %c0_i32, %c0_i32_0, %c0_i32_1 : i32, i32, i32
  }
  func.func @transform_5(%arg0: i32) -> (i32, i32, i32, i32) {
    %c0_i32 = arith.constant 0 : i32
    %c0_i32_0 = arith.constant 0 : i32
    %c0_i32_1 = arith.constant 0 : i32
    %c0_i32_2 = arith.constant 0 : i32
    %c0_i32_3 = arith.constant 0 : i32
    return %c0_i32, %c0_i32_0, %c0_i32_1, %c0_i32_2 : i32, i32, i32, i32
  }
  func.func @transform_6(%arg0: i32) -> (i32, i32, i32) {
    %c0_i32 = arith.constant 0 : i32
    %c0_i32_0 = arith.constant 0 : i32
    %c0_i32_1 = arith.constant 0 : i32
    %c0_i32_2 = arith.constant 0 : i32
    return %c0_i32, %c0_i32_0, %c0_i32_1 : i32, i32, i32
  }
  func.func @transform_7(%arg0: i32) -> (i32, i32, i32) {
    %c0_i32 = arith.constant 0 : i32
    %c0_i32_0 = arith.constant 0 : i32
    %c0_i32_1 = arith.constant 0 : i32
    %c0_i32_2 = arith.constant 0 : i32
    return %c0_i32, %c0_i32_0, %c0_i32_1 : i32, i32, i32
  }
  func.func @transform_8(%arg0: i32) -> (i32, i32, i32) {
    %c0_i32 = arith.constant 0 : i32
    %c0_i32_0 = arith.constant 0 : i32
    %c0_i32_1 = arith.constant 0 : i32
    %c0_i32_2 = arith.constant 0 : i32
    return %c0_i32, %c0_i32_0, %c0_i32_1 : i32, i32, i32
  }
  func.func @transform_9(%arg0: i32) -> (i32, i32, i32) {
    %c0_i32 = arith.constant 0 : i32
    %c0_i32_0 = arith.constant 0 : i32
    %c0_i32_1 = arith.constant 0 : i32
    %c0_i32_2 = arith.constant 0 : i32
    return %c0_i32, %c0_i32_0, %c0_i32_1 : i32, i32, i32
  }
  func.func @transform_10(%arg0: i32) -> (i32, i32, i32) {
    %c0_i32 = arith.constant 0 : i32
    %c0_i32_0 = arith.constant 0 : i32
    %c0_i32_1 = arith.constant 0 : i32
    %c0_i32_2 = arith.constant 0 : i32
    return %c0_i32, %c0_i32_0, %c0_i32_1 : i32, i32, i32
  }
  func.func @transform_11(%arg0: i32) -> (i32, i32, i32) {
    %c0_i32 = arith.constant 0 : i32
    %c0_i32_0 = arith.constant 0 : i32
    %c0_i32_1 = arith.constant 0 : i32
    %c0_i32_2 = arith.constant 0 : i32
    return %c0_i32, %c0_i32_0, %c0_i32_1 : i32, i32, i32
  }
  func.func @transform_12(%arg0: i32) -> (i32, i32, i32) {
    %c0_i32 = arith.constant 0 : i32
    %c0_i32_0 = arith.constant 0 : i32
    %c0_i32_1 = arith.constant 0 : i32
    %c0_i32_2 = arith.constant 0 : i32
    return %c0_i32, %c0_i32_0, %c0_i32_1 : i32, i32, i32
  }
  func.func @transform_13(%arg0: i32) -> (i32, i32) {
    %c0_i32 = arith.constant 0 : i32
    %c0_i32_0 = arith.constant 0 : i32
    %c0_i32_1 = arith.constant 0 : i32
    return %c0_i32, %c0_i32_0 : i32, i32
  }
  func.func @transform_14(%arg0: i32) -> (i32, i32) {
    %c0_i32 = arith.constant 0 : i32
    %c0_i32_0 = arith.constant 0 : i32
    %c0_i32_1 = arith.constant 0 : i32
    return %c0_i32, %c0_i32_0 : i32, i32
  }
  func.func @transform_15(%arg0: i32) -> (i32, i32) {
    %c0_i32 = arith.constant 0 : i32
    %c0_i32_0 = arith.constant 0 : i32
    %c0_i32_1 = arith.constant 0 : i32
    return %c0_i32, %c0_i32_0 : i32, i32
  }
  func.func @transform_16(%arg0: i32) -> (i32, i32) {
    %c0_i32 = arith.constant 0 : i32
    %c0_i32_0 = arith.constant 0 : i32
    %c0_i32_1 = arith.constant 0 : i32
    return %c0_i32, %c0_i32_0 : i32, i32
  }
  func.func @transform_17(%arg0: i32) -> (i32, i32, i32) {
    %c0_i32 = arith.constant 0 : i32
    %c0_i32_0 = arith.constant 0 : i32
    %c0_i32_1 = arith.constant 0 : i32
    return %arg0, %c0_i32, %c0_i32_0 : i32, i32, i32
  }
  func.func @transform_18(%arg0: i32) -> (i32, i32, i32, i32) {
    %c0_i32 = arith.constant 0 : i32
    %c0_i32_0 = arith.constant 0 : i32
    %c0_i32_1 = arith.constant 0 : i32
    %c0_i32_2 = arith.constant 0 : i32
    return %arg0, %c0_i32, %c0_i32_0, %c0_i32_1 : i32, i32, i32, i32
  }
}

</mosaic_0001>

<bundles_post_ra>
// kernel: tpu_custom_call.1
= control target key start
LH: loop header
LB: loop body
LE: loop exit
PB: predicated region body
PF: predicated region fallthrough
CT: control target
= control target key end

     0   :  { %s4076_s0 = inlined_call_operand.vmem [shape: f32[2,8,32], index: 0, kind: input, shape index: {}]   ;;  %s4077_s1 = inlined_call_operand.vmem [shape: f32[4,8,8], index: 1, kind: input, shape index: {}]   ;;  %s4078_s2 = inlined_call_operand.vmem [shape: f32[2,1,32], index: 2, kind: input, shape index: {}]   ;;  %s4079_s3 = inlined_call_operand.vmem [shape: f32[2,1,32], index: 3, kind: input, shape index: {}]   ;;  %s4080_s4 = inlined_call_operand.vmem [shape: bf16[2,32,96], index: 4, kind: input, shape index: {}]   ;;  %s4081_s5 = inlined_call_operand.vmem [shape: bf16[2,4,8,32], index: 5, kind: input, shape index: {}]   ;;  %s4082_s6 = inlined_call_operand.vmem [shape: f32[2,1,32], index: 6, kind: input, shape index: {}]   ;;  %s4083_s7 = inlined_call_operand.vmem [shape: f32[2,1,32], index: 7, kind: input, shape index: {}]   ;;  %s4084_s8 = inlined_call_operand.vmem [shape: f32[2,1,32], index: 8, kind: input, shape index: {}]   ;;  %s4085_s9 = inlined_call_operand.vmem [shape: bf16[2,32,128], index: 9, kind: input, shape index: {}]   ;;  %s4086_s10 = inlined_call_operand.vmem [shape: f32[2,1,128], index: 10, kind: input, shape index: {}]   ;;  %s4087_s11 = inlined_call_operand.vmem [shape: bf16[2,128,32], index: 11, kind: input, shape index: {}]   ;;  %s4088_s12 = inlined_call_operand.vmem [shape: f32[2,1,32], index: 12, kind: input, shape index: {}]   ;;  %s4089_s13 = inlined_call_operand.vmem [shape: f32[1,32], index: 13, kind: input, shape index: {}]   ;;  %s4090_s14 = inlined_call_operand.vmem [shape: f32[1,32], index: 14, kind: input, shape index: {}]   ;;  %s4091_s15 = inlined_call_operand.vmem [shape: bf16[32,128], index: 15, kind: input, shape index: {}]   ;;  %s4092_s16 = inlined_call_operand.vmem [shape: f32[1,128], index: 16, kind: input, shape index: {}]   ;;  %s4093_s17 = inlined_call_operand.hbm [shape: f32[2,8,128], index: 17, kind: output, shape index: {0}]   ;;  %s4094_s18 = inlined_call_operand.hbm [shape: f32[2,4,8,8], index: 18, kind: output, shape index: {1}]  }
   0x1   :  { %4108 = sst [smem:[#allocation11_spill]] %s4076_s0 }
   0x2   :  { %4109 = sst [smem:[#allocation12_spill]] %s4077_s1 }
   0x3   :  { %4110 = sst [smem:[#allocation13_spill]] %s4078_s2 }
   0x4   :  { %4111 = sst [smem:[#allocation14_spill]] %s4079_s3 }
   0x5   :  { %4112 = sst [smem:[#allocation15_spill]] %s4080_s4 }
   0x6   :  { %4113 = sst [smem:[#allocation16_spill]] %s4081_s5 }
   0x7   :  { %4114 = sst [smem:[#allocation17_spill]] %s4082_s6 }
   0x8   :  { %4115 = sst [smem:[#allocation18_spill]] %s4083_s7 }
   0x9   :  { %4116 = sst [smem:[#allocation19_spill]] %s4084_s8 }
   0xa   :  { %4117 = sst [smem:[#allocation20_spill]] %s4085_s9 }
   0xb   :  { %24 = vsyncpa [#allocation3], 0 }
   0xc   :  { %26 = vsyncpa [#allocation3 + $0x1], 0 }
   0xd   :  { %27 = vsyncpa [#allocation5], 0 }
   0xe   :  { %29 = vsyncpa [#allocation5 + $0x1], 0  ;;  %s3472_s27 = smov 0   ;;  %s3474_s28 = smov 0  }
   0xf   :  { %s3476_s29 = smov 0   ;;  %s3478_s30 = smov 0  }
  0x10 LB: > { %4118 = sst [smem:[#allocation8_spill]] %s3360_s29  ;;  %s3493_s0 = sadd.s32 4294967295, %s3364_s30   ;;  %s3364_s30 = sphi %s3478_s30, %s4139_s30   ;;  %s3360_s29 = sphi %s3476_s29, %s4141_s29   ;;  %s3356_s28 = sphi %s3474_s28, %s4143_s28   ;;  %s3352_s27 = sphi %s3472_s27, %s4142_s27  }
  0x11   : > { %s2726_s19 = sadd.s32 4294967294, %s3364_s30   ;;  %s3497_s1 = sadd.s32 1, %s3364_s30  }
  0x12   : > { %4119 = sst [smem:[#allocation9_spill]] %s3497_s1  ;;  %s404_s20 = sadd.s32 1, %s3360_s29 }
  0x13   : > { %s401_s21 = ssub.s32 %s3364_s30, %s3497_s1  ;;  %p414_p0 = scmp.ne.s32.totalorder %s3360_s29, %s3356_s28 }
  0x14   : > { %p402_p1 = scmp.eq.s32.totalorder %s401_s21, 0  ;;  %p415_p2 = scmp.eq.s32.totalorder %s3493_s0, 1 }
  0x15   : > { %p420_p3 = scmp.ne.s32.totalorder %s3356_s28, %s3352_s27  ;;  %p421_p4 = scmp.eq.s32.totalorder %s2726_s19, 1 }
  0x16   : > { %s3508_s22 = scalar_select %p402_p1, %s3360_s29, %s404_s20  }
  0x17   : > { %p3510_p5 = por %p415_p2, %p414_p0  ;;  %p3514_p6 = por %p421_p4, %p420_p3 }
  0x18   : > { %4120 = sst [smem:[#allocation10_spill]] %s3508_s22  ;;  %p2729_p7 = scmp.ge.s32.totalorder %s3364_s30, 1 }
  0x19   : > { %p520_p8 = scmp.lt.s32.totalorder %s3364_s30, 3 }
  0x1b   : > { %p521_p9 = pnand %p2729_p7, %p520_p8 }
  0x1c   : > { %p578_p10 = scmp.lt.s32.totalorder (!%p521_p9), %s3493_s0, 1  ;;  %s4123_s20 = sld [smem:[#allocation11_spill]] (!%p521_p9) }
  0x1d   : > { %524 = sbr.rel (%p521_p9) target bundleno = 5282 (0x14a2), region = 88  ;;  %s4124_s4 = sld [smem:[#allocation15_spill]] (!%p521_p9) }
  0x1e   : > { %s4126_s3 = sld [smem:[#allocation14_spill]] (!%p521_p9)  ;;  %s4100_s26 = smov (!%p521_p9), 120  }
  0x1f   : > { %s4103_s22 = smov (!%p521_p9), 112   ;;  %s4097_s19 = smov (!%p521_p9), 96  }
  0x20   : > { %s4128_s5 = sld [smem:[#allocation16_spill]] (!%p521_p9)  ;;  %s4134_s29 = smov (!%p521_p9), 120  }
  0x21   : > { %s4129_s6 = sld [smem:[#allocation17_spill]] (!%p521_p9)  ;;  %s4135_s1 = smov (!%p521_p9), 104  }
  0x22   : > { %s579_s24 = scalar_select %p578_p10, %s3493_s0, 1  ;;  %vm590_vm0 = vcmask 261120   ;;  %v3366_v8 = vmov 0.0   ;;  %vm3367_vm1 = vmmov 0   ;;  %vm689_vm2 = vcmask 64512  }
  0x23   : > { %v3206_v7 = vld [vmem:[%s4124_s4 + $0x8] sm:$0xff]   ;;  %2929 = vmatprep.subr.bf16.mxu1 %v3366_v8  ;;  %2933 = vmatprep.mubr.msk.bf16.mxu1 %vm3367_vm1, %v3366_v8  ;;  %v3207_v9 = vld [vmem:[%s4124_s4] sm:$0xff]   ;;  %vm933_vm3 = vcmask 1043456   ;;  %s4130_s9 = sld [smem:[#allocation20_spill]] }
  0x24   : > { %s2732_s25 = sshll.u32 %s579_s24, 3  ;;  %2930 = vmatpush3.bf16.msra.mxu1 %v3206_v7  ;;  %2943 = vmatprep.subr.bf16.mxu0 %v3366_v8  ;;  %v2734_v16 = vld [vmem:[%s4126_s3] ss:$0 sm:$0xff]  ;;  %s4131_s7 = sld [smem:[#allocation18_spill]] }
  0x25   : > { %s581_s21 = scalar_lea.vmem %s4123_s20, %s2732_s25  ;;  %2931 = vmatprep.subr.bf16.mxu1 %v3366_v8  ;;  %2945 = vmatprep.mubr.msk.bf16.mxu0 %vm3367_vm1, %v3366_v8  ;;  %s4125_s20 = sld [smem:[#allocation13_spill]] }
  0x26   : > { %v3525_v0 = vld [vmem:[%s581_s21] sm:$0xff]  ;;  %s4099_s25 = smov 104   ;;  %s4101_s21 = smov 64  }
  0x27   : > { %v591_v1 = vsel %vm590_vm0, %v3525_v0, 0.0  ;;  %s4132_s8 = sld [smem:[#allocation19_spill]] }
  0x28   : > { %592 = vadd.xlane.f32.xlu0 %v591_v1  ;;  %2932 = vmatpush3.bf16.msra.mxu1 %v3207_v9 }
  0x29   : > { %2937 = vmatprep.subr.bf16.mxu1 %v3366_v8 }
  0x2b   : > { %v2733_v14 = vld [vmem:[%s4125_s20] ss:$0 sm:$0xff] }
  0xb1   : > { %v593_v2 = vpop.xlane.xlu0 %592 }
  0xb2   : > { %v595_v3 = vmul.f32 0.03125, %v593_v2 }
  0xb4   : > { %v596_v4 = vsub.f32 %v3525_v0, %v595_v3 }
  0xb6   : > { %v597_v5 = vmul.f32 %v596_v4, %v596_v4 }
  0xb8   : > { %v598_v6 = vsel %vm590_vm0, %v597_v5, 0.0 }
  0xb9   : > { %599 = vadd.xlane.f32.xlu0 %v598_v6 }
 0x142   : > { %v600_v10 = vpop.xlane.xlu0 %599 }
 0x143   : > { %v601_v11 = vmul.f32 0.03125, %v600_v10 }
 0x145   : > { %v602_v12 = vadd.f32 1e-05, %v601_v11 }
 0x147   : > { %3232 = vrsqrt.f32 %v602_v12 }
 0x154   : > { %v3233_v13 = vpop.eup %3232 }
 0x155   : > { %v604_v15 = vmul.f32 %v3233_v13, %v596_v4 }
 0x157   : > { %v611_v17 = vmul.f32 %v2733_v14, %v604_v15 }
 0x159   : > { %v618_v18 = vadd.f32 %v2734_v16, %v611_v17 }
 0x15b   : > { %v619_v19 = vpack.c.bf16 %v618_v18, %v618_v18 }
 0x15d   : > { %2934 = vmatmul.mubr.msk.bf16.vlgmr.msra.gmra.mxu1 %vm590_vm0, %v619_v19 }
 0x15e   : > { %2939 = vmatprep.mubr.msk.bf16.mxu1 %vm3367_vm1, %v3366_v8 }
 0x21d   : > { %v673_v20 = vpop.f32.mrf.mxu1 }
 0x21e   : > { %v3554_v21 = vpack.c.bf16 %v673_v20, %v673_v20 }
 0x21f   : > { %v2935_v22 = vpop.f32.mrf.mxu1 }
 0x220   : > { %685 = vrot.lane.b32.xlu0 %v3554_v21, %s4099_s25  ;;  %681 = vrot.lane.b32.xlu1 %v3554_v21, %s4100_s26  ;;  %s4137_s25 = smov 64   ;;  %s3853_s26 = sand.u32 1, %s3356_s28  }
 0x221   : > { %v676_v23 = vpop.f32.mrf.mxu1 }
 0x223   : > { %v2936_v24 = vpop.f32.mrf.mxu1 }
 0x224   : > { %683 = vrot.lane.b32.xlu1 %v3554_v21, %s4103_s22  ;;  %s4133_s22 = smov 112  }
 0x228   : > { %687 = vrot.lane.b32.xlu1 %v3554_v21, %s4097_s19 }
 0x292   : > { %v3564_v25 = vpop.permute.xlu1 %681  ;;  %v3572_v27 = vpop.permute.xlu0 %685 }
 0x293   : > { %736 = vrot.lane.b32.xlu1 %v3564_v25, %s4097_s19 }
 0x296   : > { %v3568_v26 = vpop.permute.xlu1 %683 }
 0x297   : > { %784 = vrot.lane.b32.xlu1 %v3568_v26, %s4097_s19 }
 0x29a   : > { %v688_v28 = vpop.permute.xlu1 %687 }
 0x29b   : > { %v694_v29 = vsel %vm689_vm2, %v688_v28, 0  ;;  %832 = vrot.lane.b32.xlu1 %v3572_v27, %s4097_s19  ;;  %s4127_s19 = sld [smem:[#allocation12_spill]] }
 0x29c   : > { %2938 = vmatpush3.bf16.xpose.msra.mxu1 %v694_v29 }
 0x29d   : > { %2949 = vmatprep.subr.bf16.mxu1 %v3366_v8 }
 0x2a1   : > { %v3603_v36 = vld [vmem:[%s4127_s19] sm:$0xff]  ;;  %v3610_v43 = vld [vmem:[%s4127_s19 + $0x8] sm:$0xff]  ;;  %v3616_v47 = vld [vmem:[%s4127_s19 + $0x10] sm:$0xff] }
 0x2a2   : > { %v3623_v54 = vld [vmem:[%s4127_s19 + $0x18] sm:$0xff]  ;;  %s4136_s19 = smov 96  }
 0x2a3   : > { %2940 = vmatmul.mubr.msk.bf16.vlgmr.msra.gmra.mxu1 %vm689_vm2, %v3554_v21 }
 0x2a4   : > { %2951 = vmatprep.mubr.msk.bf16.mxu1 %vm3367_vm1, %v3366_v8 }
 0x305   : > { %v737_v30 = vpop.permute.xlu1 %736 }
 0x306   : > { %v742_v31 = vsel %vm689_vm2, %v737_v30, 0 }
 0x307   : > { %2944 = vmatpush3.bf16.xpose.msra.mxu0 %v742_v31 }
 0x308   : > { %2955 = vmatprep.subr.bf16.mxu0 %v3366_v8 }
 0x309   : > { %v785_v32 = vpop.permute.xlu1 %784 }
 0x30a   : > { %v790_v33 = vsel %vm689_vm2, %v785_v32, 0 }
 0x30b   : > { %2950 = vmatpush3.bf16.xpose.msra.mxu1 %v790_v33 }
 0x30c   : > { %2961 = vmatprep.subr.bf16.mxu1 %v3366_v8 }
 0x30d   : > { %v833_v34 = vpop.permute.xlu1 %832 }
 0x30e   : > { %v838_v35 = vsel %vm689_vm2, %v833_v34, 0  ;;  %2946 = vmatmul.mubr.msk.bf16.vlgmr.msra.gmra.mxu0 %vm689_vm2, %v3564_v25 }
 0x30f   : > { %2956 = vmatpush3.bf16.xpose.msra.mxu0 %v838_v35  ;;  %2957 = vmatprep.mubr.msk.bf16.mxu0 %vm3367_vm1, %v3366_v8 }
 0x310   : > { %2967 = vmatprep.subr.bf16.mxu0 %v3366_v8 }
 0x312   : > { %2952 = vmatmul.mubr.msk.bf16.vlgmr.msra.gmra.mxu1 %vm689_vm2, %v3568_v26 }
 0x313   : > { %2963 = vmatprep.mubr.msk.bf16.mxu1 %vm3367_vm1, %v3366_v8 }
 0x316   : > { %2958 = vmatmul.mubr.msk.bf16.vlgmr.msra.gmra.mxu0 %vm689_vm2, %v3572_v27 }
 0x317   : > { %2969 = vmatprep.mubr.msk.bf16.mxu0 %vm3367_vm1, %v3366_v8 }
 0x363   : > { %v730_v37 = vpop.f32.mrf.mxu1 }
 0x364   : > { %v731_v38 = vadd.f32 %v730_v37, %v3603_v36 }
 0x365   : > { %v2941_v39 = vpop.f32.mrf.mxu1 }
 0x366   : > { %v880_v40 = vsel %vm689_vm2, %v731_v38, -inf }
 0x367   : > { %881 = vmax.xlane.f32.xlu1 %v880_v40  ;;  %v733_v41 = vpop.f32.mrf.mxu1 }
 0x368   : > { %v1125_v41 = vld [vmem:[%s4128_s5] sm:$0xf] }
 0x369   : > { %v2942_v42 = vpop.f32.mrf.mxu1 }
 0x3ce   : > { %v778_v44 = vpop.f32.mrf.mxu0 }
 0x3cf   : > { %v779_v45 = vadd.f32 %v778_v44, %v3610_v43 }
 0x3d0   : > { %v2947_v46 = vpop.f32.mrf.mxu0 }
 0x3d1   : > { %v883_v48 = vsel %vm689_vm2, %v779_v45, -inf  ;;  %v1133_v46 = vsel %vm933_vm3, %v1125_v41, 0 }
 0x3d2   : > { %884 = vmax.xlane.f32.xlu0 %v883_v48  ;;  %v781_v49 = vpop.f32.mrf.mxu0  ;;  %v826_v50 = vpop.f32.mrf.mxu1 }
 0x3d3   : > { %v827_v51 = vadd.f32 %v826_v50, %v3616_v47  ;;  %v1126_v49 = vld [vmem:[%s4128_s5 + $0x4] sm:$0xf] }
 0x3d4   : > { %v2948_v52 = vpop.f32.mrf.mxu0  ;;  %v2953_v53 = vpop.f32.mrf.mxu1 }
 0x3d5   : > { %v886_v55 = vsel %vm689_vm2, %v827_v51, -inf  ;;  %v1179_v52 = vsel %vm933_vm3, %v1126_v49, 0  ;;  %v1127_v53 = vld [vmem:[%s4128_s5 + $0x8] sm:$0xf] }
 0x3d6   : > { %v874_v56 = vpop.f32.mrf.mxu0  ;;  %887 = vmax.xlane.f32.xlu1 %v886_v55  ;;  %v829_v57 = vpop.f32.mrf.mxu1 }
 0x3d7   : > { %v875_v58 = vadd.f32 %v874_v56, %v3623_v54  ;;  %v1225_v57 = vsel %vm933_vm3, %v1127_v53, 0  ;;  %v3211_v53 = vld [vmem:[%s4087_s11 + $0x30] sm:$0xff]  }
 0x3d8   : > { %v2954_v59 = vpop.f32.mrf.mxu1  ;;  %v2959_v60 = vpop.f32.mrf.mxu0 }
 0x3d9   : > { %v889_v61 = vsel %vm689_vm2, %v875_v58, -inf }
 0x3da   : > { %890 = vmax.xlane.f32.xlu0 %v889_v61  ;;  %v877_v62 = vpop.f32.mrf.mxu0  ;;  %v1128_v61 = vld [vmem:[%s4128_s5 + $0xc] sm:$0xf] }
 0x3dc   : > { %v2960_v63 = vpop.f32.mrf.mxu0 }
 0x3e7   : > { %928 = vrot.lane.b32.xlu1 %v3554_v21, %s4101_s21 }
 0x3f0   : > { %v882_v1 = vpop.xlane.xlu1 %881 }
 0x3f1   : > { %v892_v2 = vsub.f32 %v731_v38, %v882_v1  ;;  %v1271_v1 = vsel %vm933_vm3, %v1128_v61, 0 }
 0x3f3   : > { %v896_v3 = vmul.f32 1.442695, %v892_v2 }
 0x3f5   : > { %3234 = vpow2.f32 %v896_v3 }
 0x402   : > { %v3235_v4 = vpop.eup %3234 }
 0x403   : > { %v904_v5 = vsel %vm689_vm2, %v3235_v4, 0.0 }
 0x40b   : > { %905 = vadd.xlane.f32.xlu1 %v904_v5 }
 0x45b   : > { %v885_v6 = vpop.xlane.xlu0 %884 }
 0x45c   : > { %v893_v7 = vsub.f32 %v779_v45, %v885_v6 }
 0x45e   : > { %v898_v9 = vmul.f32 1.442695, %v893_v7 }
 0x45f   : > { %v888_v10 = vpop.xlane.xlu1 %887 }
 0x460   : > { %3236 = vpow2.f32 %v898_v9  ;;  %v894_v11 = vsub.f32 %v827_v51, %v888_v10 }
 0x462   : > { %v900_v12 = vmul.f32 1.442695, %v894_v11 }
 0x463   : > { %v891_v13 = vpop.xlane.xlu0 %890  ;;  %v929_v14 = vpop.permute.xlu1 %928 }
 0x464   : > { %3238 = vpow2.f32 %v900_v12  ;;  %v895_v15 = vsub.f32 %v875_v58, %v891_v13  ;;  %v935_v16 = vsel %vm933_vm3, %v929_v14, 0 }
 0x465   : > { %2962 = vmatpush3.bf16.msra.mxu1 %v935_v16 }
 0x466   : > { %v902_v17 = vmul.f32 1.442695, %v895_v15  ;;  %2973 = vmatprep.subr.bf16.mxu1 %v3366_v8 }
 0x468   : > { %3240 = vpow2.f32 %v902_v17 }
 0x46d   : > { %v3237_v18 = vpop.eup %3236 }
 0x46e   : > { %v907_v19 = vsel %vm689_vm2, %v3237_v18, 0.0 }
 0x46f   : > { %908 = vadd.xlane.f32.xlu0 %v907_v19 }
 0x471   : > { %v3239_v20 = vpop.eup %3238 }
 0x472   : > { %v910_v21 = vsel %vm689_vm2, %v3239_v20, 0.0 }
 0x473   : > { %911 = vadd.xlane.f32.xlu1 %v910_v21 }
 0x475   : > { %v3241_v22 = vpop.eup %3240 }
 0x476   : > { %v913_v23 = vsel %vm689_vm2, %v3241_v22, 0.0 }
 0x477   : > { %914 = vadd.xlane.f32.xlu0 %v913_v23 }
 0x484   : > { %1025 = vrot.lane.b32.xlu1 %v3568_v26, %s4101_s21 }
 0x488   : > { %1073 = vrot.lane.b32.xlu1 %v3572_v27, %s4101_s21 }
 0x48d   : > { %977 = vrot.lane.b32.xlu0 %v3564_v25, %s4101_s21  ;;  %s2731_s21 = sshll.u32 %s3853_s26, 5 }
 0x48e   : > { %s3856_s24 = scalar_lea.vmem [#allocation4], %s2731_s21 }
 0x494   : > { %v906_v24 = vpop.xlane.xlu1 %905 }
 0x495   : > { %3242 = vrcp.f32 %v906_v24 }
 0x4a2   : > { %v3243_v28 = vpop.eup %3242 }
 0x4a3   : > { %v920_v29 = vmul.f32 %v3243_v28, %v3235_v4 }
 0x4a5   : > { %v924_v30 = vpack.c.bf16 %v920_v29, %v920_v29 }
 0x4a7   : > { %2964 = vmatmul.mubr.msk.bf16.vlgmr.msra.gmra.mxu1 %vm689_vm2, %v924_v30 }
 0x4a8   : > { %2975 = vmatprep.mubr.msk.bf16.mxu1 %vm3367_vm1, %v3366_v8 }
 0x4f8   : > { %v909_v31 = vpop.xlane.xlu0 %908 }
 0x4f9   : > { %3244 = vrcp.f32 %v909_v31 }
 0x4fc   : > { %v912_v32 = vpop.xlane.xlu1 %911 }
 0x4fd   : > { %3246 = vrcp.f32 %v912_v32 }
 0x500   : > { %v915_v26 = vpop.xlane.xlu0 %914  ;;  %v1026_v33 = vpop.permute.xlu1 %1025 }
 0x501   : > { %3248 = vrcp.f32 %v915_v26  ;;  %v1031_v27 = vsel %vm933_vm3, %v1026_v33, 0 }
 0x502   : > { %2974 = vmatpush3.bf16.msra.mxu1 %v1031_v27 }
 0x503   : > { %2985 = vmatprep.subr.bf16.mxu1 %v3366_v8 }
 0x504   : > { %v978_v25 = vpop.permute.xlu0 %977  ;;  %v1074_v38 = vpop.permute.xlu1 %1073 }
 0x505   : > { %v983_v34 = vsel %vm933_vm3, %v978_v25, 0  ;;  %v1079_v42 = vsel %vm933_vm3, %v1074_v38, 0  ;;  %v2750_v38 = vld [vmem:[%s4129_s6] ss:$0 sm:$0xff] }
 0x506   : > { %v3245_v35 = vpop.eup %3244  ;;  %2968 = vmatpush3.bf16.msra.mxu0 %v983_v34 }
 0x507   : > { %2979 = vmatprep.subr.bf16.mxu0 %v3366_v8  ;;  %v921_v37 = vmul.f32 %v3245_v35, %v3237_v18 }
 0x509   : > { %v925_v39 = vpack.c.bf16 %v921_v37, %v921_v37 }
 0x50a   : > { %v3247_v40 = vpop.eup %3246 }
 0x50b   : > { %2970 = vmatmul.mubr.msk.bf16.vlgmr.msra.gmra.mxu0 %vm689_vm2, %v925_v39  ;;  %v922_v44 = vmul.f32 %v3247_v40, %v3239_v20 }
 0x50c   : > { %2980 = vmatpush3.bf16.msra.mxu0 %v1079_v42  ;;  %2981 = vmatprep.mubr.msk.bf16.mxu0 %vm3367_vm1, %v3366_v8 }
 0x50d   : > { %v926_v45 = vpack.c.bf16 %v922_v44, %v922_v44  ;;  %2991 = vmatprep.subr.bf16.mxu0 %v3366_v8 }
 0x50e   : > { %v3249_v48 = vpop.eup %3248 }
 0x50f   : > { %2976 = vmatmul.mubr.msk.bf16.vlgmr.msra.gmra.mxu1 %vm689_vm2, %v926_v45  ;;  %v923_v50 = vmul.f32 %v3249_v48, %v3241_v22 }
 0x510   : > { %2986 = vmatpush3.bf16.msra.mxu1 %v1133_v46  ;;  %2987 = vmatprep.mubr.msk.bf16.mxu1 %vm3367_vm1, %v3366_v8 }
 0x511   : > { %v927_v51 = vpack.c.bf16 %v923_v50, %v923_v50  ;;  %2997 = vmatprep.subr.bf16.mxu1 %v3366_v8 }
 0x513   : > { %2982 = vmatmul.mubr.msk.bf16.vlgmr.msra.gmra.mxu0 %vm689_vm2, %v927_v51  ;;  %v3209_v51 = vld [vmem:[%s4130_s9] sm:$0xff]  }
 0x514   : > { %2992 = vmatpush3.bf16.msra.mxu0 %v1179_v52  ;;  %2993 = vmatprep.mubr.msk.bf16.mxu0 %vm3367_vm1, %v3366_v8  ;;  %v3210_v52 = vld [vmem:[%s4087_s11 + $0x38] sm:$0xff]  }
 0x515   : > { %3003 = vmatprep.subr.bf16.mxu0 %v3366_v8 }
 0x567   : > { %v971_v55 = vpop.f32.mrf.mxu1 }
 0x568   : > { %v1121_v56 = vpack.c.bf16 %v971_v55, %v971_v55  ;;  %v3212_v55 = vld [vmem:[%s4087_s11 + $0x28] sm:$0xff]  }
 0x569   : > { %v2965_v58 = vpop.f32.mrf.mxu1 }
 0x56a   : > { %2988 = vmatmul.mubr.msk.bf16.vlgmr.msra.gmra.mxu1 %vm689_vm2, %v1121_v56  ;;  %v3213_v56 = vld [vmem:[%s4087_s11 + $0x20] sm:$0xff]   ;;  %v3215_v58 = vld [vmem:[%s4087_s11 + $0x10] sm:$0xff]  }
 0x56b   : > { %v974_v59 = vpop.f32.mrf.mxu1  ;;  %2998 = vmatpush3.bf16.msra.mxu1 %v1225_v57  ;;  %2999 = vmatprep.mubr.msk.bf16.mxu1 %vm3367_vm1, %v3366_v8  ;;  %v3214_v57 = vld [vmem:[%s4087_s11 + $0x18] sm:$0xff]  }
 0x56c   : > { %3009 = vmatprep.subr.bf16.mxu1 %v3366_v8 }
 0x56d   : > { %v2966_v60 = vpop.f32.mrf.mxu1 }
 0x5cb   : > { %v1019_v62 = vpop.f32.mrf.mxu0 }
 0x5cc   : > { %v1122_v63 = vpack.c.bf16 %v1019_v62, %v1019_v62 }
 0x5cd   : > { %v2971_v2 = vpop.f32.mrf.mxu0 }
 0x5ce   : > { %2994 = vmatmul.mubr.msk.bf16.vlgmr.msra.gmra.mxu0 %vm689_vm2, %v1122_v63  ;;  %v2751_v63 = vld [vmem:[%s4131_s7] ss:$0 sm:$0xff] }
 0x5cf   : > { %v1022_v3 = vpop.f32.mrf.mxu0  ;;  %v1067_v4 = vpop.f32.mrf.mxu1  ;;  %3004 = vmatpush3.bf16.msra.mxu0 %v1271_v1  ;;  %3005 = vmatprep.mubr.msk.bf16.mxu0 %vm3367_vm1, %v3366_v8  ;;  %v2752_v2 = vld [vmem:[%s4132_s8] ss:$0 sm:$0xff] }
 0x5d0   : > { %v1123_v5 = vpack.c.bf16 %v1067_v4, %v1067_v4  ;;  %3017 = vmatprep.subr.bf16.mxu0 %v3366_v8 }
 0x5d1   : > { %v2972_v6 = vpop.f32.mrf.mxu0  ;;  %v2977_v7 = vpop.f32.mrf.mxu1 }
 0x5d2   : > { %3000 = vmatmul.mubr.msk.bf16.vlgmr.msra.gmra.mxu1 %vm689_vm2, %v1123_v5  ;;  %v3216_v6 = vld [vmem:[%s4087_s11 + $0x8] sm:$0xff]   ;;  %v3217_v7 = vld [vmem:[%s4087_s11] sm:$0xff]  }
 0x5d3   : > { %v1070_v9 = vpop.f32.mrf.mxu1  ;;  %v1115_v10 = vpop.f32.mrf.mxu0  ;;  %3013 = vmatprep.mubr.msk.bf16.mxu1 %vm3367_vm1, %v3366_v8 }
 0x5d4   : > { %v1124_v11 = vpack.c.bf16 %v1115_v10, %v1115_v10  ;;  %v2753_v9 = vld [vmem:[%s4086_s10] ss:$0 sm:$0xff] }
 0x5d5   : > { %v2978_v12 = vpop.f32.mrf.mxu1  ;;  %v2983_v13 = vpop.f32.mrf.mxu0 }
 0x5d6   : > { %3006 = vmatmul.mubr.msk.bf16.vlgmr.msra.gmra.mxu0 %vm689_vm2, %v1124_v11 }
 0x5d7   : > { %v1118_v14 = vpop.f32.mrf.mxu0  ;;  %3033 = vmatprep.mubr.msk.bf16.mxu0 %vm3367_vm1, %v3366_v8  ;;  %3018 = vmatpush3.bf16.msra.mxu0 %v3210_v52 }
 0x5d8   : > { %3019 = vmatprep.subr.bf16.mxu0 %v3366_v8 }
 0x5d9   : > { %v2984_v15 = vpop.f32.mrf.mxu0 }
 0x5db   : > { %3020 = vmatpush3.bf16.msra.mxu0 %v3211_v53 }
 0x5dc   : > { %3021 = vmatprep.subr.bf16.mxu0 %v3366_v8 }
 0x5df   : > { %3022 = vmatpush3.bf16.msra.mxu0 %v3212_v55 }
 0x5e0   : > { %3023 = vmatprep.subr.bf16.mxu0 %v3366_v8 }
 0x5e3   : > { %3024 = vmatpush3.bf16.msra.mxu0 %v3213_v56 }
 0x5e4   : > { %3025 = vmatprep.subr.bf16.mxu0 %v3366_v8 }
 0x5e7   : > { %3026 = vmatpush3.bf16.msra.mxu0 %v3214_v57 }
 0x5e8   : > { %3027 = vmatprep.subr.bf16.mxu0 %v3366_v8 }
 0x5eb   : > { %3028 = vmatpush3.bf16.msra.mxu0 %v3215_v58 }
 0x5ec   : > { %3029 = vmatprep.subr.bf16.mxu0 %v3366_v8 }
 0x5ef   : > { %3030 = vmatpush3.bf16.msra.mxu0 %v3216_v6 }
 0x5f0   : > { %3031 = vmatprep.subr.bf16.mxu0 %v3366_v8 }
 0x5f3   : > { %3032 = vmatpush3.bf16.msra.mxu0 %v3217_v7 }
 0x5f4   : > { %3063 = vmatprep.subr.bf16.mxu0 %v3366_v8 }
 0x62a   : > { %v1169_v16 = vpop.f32.mrf.mxu1 }
 0x62b   : > { %v1313_v28 = vsel %vm590_vm0, %v1169_v16, 0.0 }
 0x62c   : > { %v2989_v17 = vpop.f32.mrf.mxu1 }
 0x62e   : > { %v1172_v18 = vpop.f32.mrf.mxu1 }
 0x62f   : > { %v2765_v18 = vld [vmem:[%s4088_s12] ss:$0 sm:$0xff] }
 0x630   : > { %v2990_v19 = vpop.f32.mrf.mxu1 }
 0x68e   : > { %v1215_v20 = vpop.f32.mrf.mxu0 }
 0x68f   : > { %v1314_v22 = vsel %vm590_vm0, %v1215_v20, 0.0 }
 0x690   : > { %v2995_v21 = vpop.f32.mrf.mxu0  ;;  %v1315_v30 = vadd.f32 %v1314_v22, %v1313_v28 }
 0x692   : > { %v1218_v23 = vpop.f32.mrf.mxu0  ;;  %v1261_v24 = vpop.f32.mrf.mxu1 }
 0x693   : > { %v1316_v29 = vsel %vm590_vm0, %v1261_v24, 0.0 }
 0x694   : > { %v2996_v31 = vpop.f32.mrf.mxu0  ;;  %v3001_v32 = vpop.f32.mrf.mxu1  ;;  %v1317_v26 = vadd.f32 %v1316_v29, %v1315_v30 }
 0x696   : > { %v1264_v33 = vpop.f32.mrf.mxu1  ;;  %v1307_v27 = vpop.f32.mrf.mxu0 }
 0x697   : > { %v1318_v25 = vsel %vm590_vm0, %v1307_v27, 0.0  ;;  %v3219_v33 = vld [vmem:[%s4124_s4 + $0x10] sm:$0xff]  }
 0x698   : > { %v1319_v34 = vadd.f32 %v1318_v25, %v1317_v26  ;;  %v3002_v35 = vpop.f32.mrf.mxu1  ;;  %v3007_v37 = vpop.f32.mrf.mxu0  ;;  %v3218_v26 = vld [vmem:[%s4124_s4 + $0x18] sm:$0xff]  }
 0x699   : > { %v2768_v37 = vld [vmem:[%s4125_s20 + $0x1] ss:$0 sm:$0xff] }
 0x69a   : > { %v1320_v39 = vadd.f32 %v1319_v34, %v3525_v0  ;;  %v1310_v40 = vpop.f32.mrf.mxu0  ;;  %v3208_v0 = vld [vmem:[%s4130_s9 + $0x8] sm:$0xff]  }
 0x69b   : > { %3010 = vmatpush3.bf16.msra.mxu1 %v3208_v0 }
 0x69c   : > { %v3008_v41 = vpop.f32.mrf.mxu0  ;;  %v3700_v42 = vadd.f32 %v2750_v38, %v1320_v39  ;;  %3011 = vmatprep.subr.bf16.mxu1 %v3366_v8  ;;  %v2769_v39 = vld [vmem:[%s4126_s3 + $0x1] ss:$0 sm:$0xff]  ;;  %s2847_s3 = sshll.u32 %s3493_s0, 9 }
 0x69e   : > { %v1331_v44 = vsel %vm590_vm0, %v3700_v42, 0.0 }
 0x69f   : > { %1332 = vadd.xlane.f32.xlu0 %v1331_v44  ;;  %3012 = vmatpush3.bf16.msra.mxu1 %v3209_v51 }
 0x6a0   : > { %3037 = vmatprep.subr.bf16.mxu1 %v3366_v8 }
 0x728   : > { %v1333_v45 = vpop.xlane.xlu0 %1332 }
 0x729   : > { %v1334_v46 = vmul.f32 0.03125, %v1333_v45 }
 0x72b   : > { %v1335_v48 = vsub.f32 %v3700_v42, %v1334_v46 }
 0x72d   : > { %v1336_v49 = vmul.f32 %v1335_v48, %v1335_v48 }
 0x72f   : > { %v1337_v50 = vsel %vm590_vm0, %v1336_v49, 0.0 }
 0x730   : > { %1338 = vadd.xlane.f32.xlu1 %v1337_v50 }
 0x7b9   : > { %v1339_v59 = vpop.xlane.xlu1 %1338 }
 0x7ba   : > { %v1340_v60 = vmul.f32 0.03125, %v1339_v59 }
 0x7bc   : > { %v1341_v61 = vadd.f32 1e-05, %v1340_v60 }
 0x7be   : > { %3250 = vrsqrt.f32 %v1341_v61 }
 0x7cb   : > { %v3251_v62 = vpop.eup %3250 }
 0x7cc   : > { %v1343_v1 = vmul.f32 %v3251_v62, %v1335_v48 }
 0x7ce   : > { %v1350_v3 = vmul.f32 %v2751_v63, %v1343_v1 }
 0x7d0   : > { %v1357_v4 = vadd.f32 %v2752_v2, %v1350_v3 }
 0x7d2   : > { %v1358_v5 = vpack.c.bf16 %v1357_v4, %v1357_v4 }
 0x7d4   : > { %3014 = vmatmul.mubr.msk.bf16.vlgmr.msra.gmra.mxu1 %vm590_vm0, %v1358_v5 }
 0x7d5   : > { %3041 = vmatprep.mubr.msk.bf16.mxu1 %vm3367_vm1, %v3366_v8  ;;  %3038 = vmatpush3.bf16.msra.mxu1 %v3218_v26 }
 0x7d6   : > { %3039 = vmatprep.subr.bf16.mxu1 %v3366_v8 }
 0x7d9   : > { %3040 = vmatpush3.bf16.msra.mxu1 %v3219_v33 }
 0x7da   : > { %3045 = vmatprep.subr.bf16.mxu1 %v3366_v8 }
 0x894   : > { %v1419_v10 = vpop.f32.mrf.mxu1 }
 0x895   : > { %v1420_v11 = vadd.f32 %v2753_v9, %v1419_v10 }
 0x896   : > { %v3015_v12 = vpop.f32.mrf.mxu1 }
 0x897   : > { %v1425_v13 = vmax.f32 %v1420_v11, 0.0 }
 0x898   : > { %v1422_v14 = vpop.f32.mrf.mxu1 }
 0x899   : > { %v1426_v15 = vpack.c.bf16 %v1425_v13, %v1425_v13 }
 0x89a   : > { %v3016_v16 = vpop.f32.mrf.mxu1 }
 0x89b   : > { %3034 = vmatmul.mubr.bf16.vlgmr.msra.gmra.mxu0 %v1426_v15 }
 0x89c   : > { %3065 = vmatprep.mubr.msk.bf16.mxu0 %vm3367_vm1, %v3366_v8 }
 0x95b   : > { %v1525_v17 = vpop.f32.mrf.mxu0 }
 0x95c   : > { %v1531_v19 = vadd.f32 %v1525_v17, %v3700_v42 }
 0x95d   : > { %v3035_v20 = vpop.f32.mrf.mxu0 }
 0x95e   : > { %v3764_v21 = vadd.f32 %v2765_v18, %v1531_v19 }
 0x95f   : > { %v1528_v22 = vpop.f32.mrf.mxu0 }
 0x960   : > { %v1544_v23 = vsel %vm590_vm0, %v3764_v21, 0.0 }
 0x961   : > { %1545 = vadd.xlane.f32.xlu0 %v1544_v23  ;;  %v3036_v24 = vpop.f32.mrf.mxu0 }
 0x9ea   : > { %v1546_v28 = vpop.xlane.xlu0 %1545 }
 0x9eb   : > { %v1547_v29 = vmul.f32 0.03125, %v1546_v28 }
 0x9ed   : > { %v1548_v30 = vsub.f32 %v3764_v21, %v1547_v29 }
 0x9ef   : > { %v1549_v31 = vmul.f32 %v1548_v30, %v1548_v30 }
 0x9f1   : > { %v1550_v32 = vsel %vm590_vm0, %v1549_v31, 0.0 }
 0x9f2   : > { %1551 = vadd.xlane.f32.xlu0 %v1550_v32 }
 0xa7b   : > { %v1552_v27 = vpop.xlane.xlu0 %1551 }
 0xa7c   : > { %v1553_v25 = vmul.f32 0.03125, %v1552_v27 }
 0xa7e   : > { %v1554_v34 = vadd.f32 1e-05, %v1553_v25 }
 0xa80   : > { %3252 = vrsqrt.f32 %v1554_v34 }
 0xa8d   : > { %v3253_v35 = vpop.eup %3252 }
 0xa8e   : > { %v1556_v38 = vmul.f32 %v3253_v35, %v1548_v30 }
 0xa90   : > { %v1563_v40 = vmul.f32 %v2768_v37, %v1556_v38 }
 0xa92   : > { %v1570_v41 = vadd.f32 %v2769_v39, %v1563_v40 }
 0xa94   : > { %v1571_v42 = vpack.c.bf16 %v1570_v41, %v1570_v41 }
 0xa96   : > { %3042 = vmatmul.mubr.msk.bf16.vlgmr.msra.gmra.mxu1 %vm590_vm0, %v1571_v42 }
 0xa97   : > { %3047 = vmatprep.mubr.msk.bf16.mxu1 %vm3367_vm1, %v3366_v8 }
 0xb56   : > { %v1626_v44 = vpop.f32.mrf.mxu1 }
 0xb57   : > { %v3787_v45 = vpack.c.bf16 %v1626_v44, %v1626_v44 }
 0xb58   : > { %v3043_v46 = vpop.f32.mrf.mxu1 }
 0xb59   : > { %1636 = vrot.lane.b32.xlu0 %v3787_v45, %s4133_s22  ;;  %1634 = vrot.lane.b32.xlu1 %v3787_v45, %s4134_s29  ;;  %s3373_s29 = smov [#allocation4]  }
 0xb5a   : > { %v1629_v48 = vpop.f32.mrf.mxu1 }
 0xb5c   : > { %v3044_v49 = vpop.f32.mrf.mxu1 }
 0xb5d   : > { %1638 = vrot.lane.b32.xlu1 %v3787_v45, %s4135_s1  ;;  %s2632_s1 = sshll.u32 %s3856_s24, 4  ;;  %s3995_s1 = int_to_ptr.vmem [resolvable:$true] %s2632_s1 }
 0xb5e   : > { %s3274_s22 = scalar_lea.vmem %s3995_s1, 512 }
 0xb5f   : > { %p3275_p11 = scmp.ne.s32.totalorder %s3995_s1, %s3274_s22 }
 0xb61   : > { %1640 = vrot.lane.b32.xlu1 %v3787_v45, %s4136_s19  ;;  %p3276_p12 = pnand %p3275_p11, %p3510_p5 }
 0xb63   : > { %p3277_p13 = pneg %p3276_p12 }
 0xbcb   : > { %v3797_v50 = vpop.permute.xlu0 %1636  ;;  %v1635_v0 = vpop.permute.xlu1 %1634 }
 0xbcc   : > { %1736 = vrot.lane.b32.xlu1 %v3797_v50, %s4136_s19  ;;  %1688 = vrot.lane.b32.xlu0 %v1635_v0, %s4136_s19 }
 0xbcf   : > { %v3802_v51 = vpop.permute.xlu1 %1638 }
 0xbd0   : > { %1784 = vrot.lane.b32.xlu0 %v3802_v51, %s4136_s19 }
 0xbd3   : > { %v1641_v52 = vpop.permute.xlu1 %1640 }
 0xbd4   : > { %v1646_v53 = vsel %vm689_vm2, %v1641_v52, 0 }
 0xbd5   : > { %3046 = vmatpush3.bf16.xpose.msra.mxu1 %v1646_v53 }
 0xbd6   : > { %3051 = vmatprep.subr.bf16.mxu1 %v3366_v8 }
 0xbdc   : > { %3048 = vmatmul.mubr.msk.bf16.vlgmr.msra.gmra.mxu1 %vm689_vm2, %v3787_v45 }
 0xbdd   : > { %3053 = vmatprep.mubr.msk.bf16.mxu1 %vm3367_vm1, %v3366_v8 }
 0xc3e   : > { %v1689_v55 = vpop.permute.xlu0 %1688  ;;  %v1737_v59 = vpop.permute.xlu1 %1736 }
 0xc3f   : > { %v1694_v56 = vsel %vm689_vm2, %v1689_v55, 0  ;;  %v1742_v60 = vsel %vm689_vm2, %v1737_v59, 0 }
 0xc40   : > { %3052 = vmatpush3.bf16.xpose.msra.mxu1 %v1694_v56 }
 0xc41   : > { %3057 = vmatprep.subr.bf16.mxu1 %v3366_v8 }
 0xc42   : > { %v1785_v57 = vpop.permute.xlu0 %1784 }
 0xc43   : > { %v1790_v58 = vsel %vm689_vm2, %v1785_v57, 0 }
 0xc44   : > { %3064 = vmatpush3.bf16.xpose.msra.mxu0 %v1790_v58 }
 0xc45   : > { %3075 = vmatprep.subr.bf16.mxu0 %v3366_v8 }
 0xc47   : > { %3054 = vmatmul.mubr.msk.bf16.vlgmr.msra.gmra.mxu1 %vm689_vm2, %v1635_v0 }
 0xc48   : > { %3058 = vmatpush3.bf16.xpose.msra.mxu1 %v1742_v60  ;;  %3059 = vmatprep.mubr.msk.bf16.mxu1 %vm3367_vm1, %v3366_v8 }
 0xc49   : > { %3069 = vmatprep.subr.bf16.mxu1 %v3366_v8 }
 0xc4b   : > { %3066 = vmatmul.mubr.msk.bf16.vlgmr.msra.gmra.mxu0 %vm689_vm2, %v3802_v51 }
 0xc4c   : > { %3077 = vmatprep.mubr.msk.bf16.mxu0 %vm3367_vm1, %v3366_v8 }
 0xc4f   : > { %3060 = vmatmul.mubr.msk.bf16.vlgmr.msra.gmra.mxu1 %vm689_vm2, %v3797_v50 }
 0xc50   : > { %3071 = vmatprep.mubr.msk.bf16.mxu1 %vm3367_vm1, %v3366_v8 }
 0xc9c   : > { %v1682_v61 = vpop.f32.mrf.mxu1 }
 0xc9d   : > { %v1683_v62 = vadd.f32 %v1682_v61, %v3603_v36 }
 0xc9e   : > { %v3049_v63 = vpop.f32.mrf.mxu1 }
 0xc9f   : > { %v1832_v1 = vsel %vm689_vm2, %v1683_v62, -inf }
 0xca0   : > { %1833 = vmax.xlane.f32.xlu1 %v1832_v1  ;;  %v1685_v2 = vpop.f32.mrf.mxu1  ;;  %v2785_v1 = vld [vmem:[%s4128_s5 + $0x10] sm:$0xf] }
 0xca2   : > { %v3050_v3 = vpop.f32.mrf.mxu1 }
 0xd07   : > { %v1730_v4 = vpop.f32.mrf.mxu1 }
 0xd08   : > { %v1731_v5 = vadd.f32 %v1730_v4, %v3610_v43 }
 0xd09   : > { %v3055_v6 = vpop.f32.mrf.mxu1 }
 0xd0a   : > { %v1835_v7 = vsel %vm689_vm2, %v1731_v5, -inf  ;;  %v2786_v6 = vld [vmem:[%s4128_s5 + $0x14] sm:$0xf] }
 0xd0b   : > { %v1826_v9 = vpop.f32.mrf.mxu0  ;;  %1836 = vmax.xlane.f32.xlu0 %v1835_v7  ;;  %v1733_v10 = vpop.f32.mrf.mxu1  ;;  %v2135_v7 = vsel %vm933_vm3, %v2786_v6, 0  ;;  %v3225_v6 = vld [vmem:[%s4087_s11 + $0x60] sm:$0xff]  }
 0xd0c   : > { %v1827_v11 = vadd.f32 %v1826_v9, %v3623_v54  ;;  %v2787_v9 = vld [vmem:[%s4128_s5 + $0x18] sm:$0xf] }
 0xd0d   : > { %v3056_v12 = vpop.f32.mrf.mxu1  ;;  %v3067_v13 = vpop.f32.mrf.mxu0 }
 0xd0e   : > { %v1841_v36 = vsel %vm689_vm2, %v1827_v11, -inf  ;;  %v2181_v12 = vsel %vm933_vm3, %v2787_v9, 0  ;;  %v3227_v9 = vld [vmem:[%s4087_s11 + $0x50] sm:$0xff]  }
 0xd0f   : > { %v1829_v14 = vpop.f32.mrf.mxu0  ;;  %1842 = vmax.xlane.f32.xlu1 %v1841_v36  ;;  %v1778_v15 = vpop.f32.mrf.mxu1 }
 0xd10   : > { %v1779_v16 = vadd.f32 %v1778_v15, %v3616_v47  ;;  %v2788_v15 = vld [vmem:[%s4128_s5 + $0x1c] sm:$0xf]  ;;  %s3278_s5 = sshll.u32 %s3373_s29, 4  ;;  %s3279_s5 = int_to_ptr.vmem [resolvable:$false] %s3278_s5 }
 0xd11   : > { %v3061_v17 = vpop.f32.mrf.mxu1  ;;  %v3068_v18 = vpop.f32.mrf.mxu0  ;;  %p3281_p0 = scmp.lt.s32.totalorder %s3995_s1, %s3279_s5 }
 0xd12   : > { %v1838_v43 = vsel %vm689_vm2, %v1779_v16, -inf  ;;  %v2227_v18 = vsel %vm933_vm3, %v2788_v15, 0  ;;  %v2798_v15 = vld [vmem:[%s4132_s8 + $0x1] ss:$0 sm:$0xff] }
 0xd13   : > { %1839 = vmax.xlane.f32.xlu0 %v1838_v43  ;;  %v1781_v19 = vpop.f32.mrf.mxu1 }
 0xd15   : > { %v3062_v20 = vpop.f32.mrf.mxu1 }
 0xd20   : > { %1932 = vrot.lane.b32.xlu1 %v1635_v0, %s4137_s25 }
 0xd29   : > { %v1834_v22 = vpop.xlane.xlu1 %1833 }
 0xd2a   : > { %v1844_v54 = vsub.f32 %v1683_v62, %v1834_v22 }
 0xd2c   : > { %v1848_v23 = vmul.f32 1.442695, %v1844_v54 }
 0xd2e   : > { %3254 = vpow2.f32 %v1848_v23 }
 0xd3b   : > { %v3255_v24 = vpop.eup %3254 }
 0xd3c   : > { %v1856_v28 = vsel %vm689_vm2, %v3255_v24, 0.0 }
 0xd3d   : > { %1857 = vadd.xlane.f32.xlu0 %v1856_v28 }
 0xd53   : > { %1884 = vrot.lane.b32.xlu0 %v3787_v45, %s4137_s25 }
 0xd94   : > { %v1837_v47 = vpop.xlane.xlu0 %1836 }
 0xd95   : > { %v1845_v29 = vsub.f32 %v1731_v5, %v1837_v47  ;;  %v2089_v5 = vsel %vm933_vm3, %v2785_v1, 0 }
 0xd97   : > { %v1850_v30 = vmul.f32 1.442695, %v1845_v29 }
 0xd98   : > { %v1843_v31 = vpop.xlane.xlu1 %1842 }
 0xd99   : > { %3256 = vpow2.f32 %v1850_v30  ;;  %v1847_v32 = vsub.f32 %v1827_v11, %v1843_v31 }
 0xd9b   : > { %v1854_v26 = vmul.f32 1.442695, %v1847_v32 }
 0xd9c   : > { %v1933_v33 = vpop.permute.xlu1 %1932  ;;  %v1840_v27 = vpop.xlane.xlu0 %1839 }
 0xd9d   : > { %3258 = vpow2.f32 %v1854_v26  ;;  %v1938_v25 = vsel %vm933_vm3, %v1933_v33, 0  ;;  %v1846_v34 = vsub.f32 %v1779_v16, %v1840_v27 }
 0xd9e   : > { %3076 = vmatpush3.bf16.msra.mxu0 %v1938_v25 }
 0xd9f   : > { %v1852_v35 = vmul.f32 1.442695, %v1846_v34  ;;  %3087 = vmatprep.subr.bf16.mxu0 %v3366_v8 }
 0xda1   : > { %3260 = vpow2.f32 %v1852_v35 }
 0xda6   : > { %v3257_v37 = vpop.eup %3256 }
 0xda7   : > { %v1859_v38 = vsel %vm689_vm2, %v3257_v37, 0.0 }
 0xda8   : > { %1860 = vadd.xlane.f32.xlu1 %v1859_v38 }
 0xdaa   : > { %v3259_v39 = vpop.eup %3258 }
 0xdab   : > { %v1865_v40 = vsel %vm689_vm2, %v3259_v39, 0.0 }
 0xdac   : > { %1866 = vadd.xlane.f32.xlu1 %v1865_v40 }
 0xdae   : > { %v3261_v41 = vpop.eup %3260 }
 0xdaf   : > { %v1862_v42 = vsel %vm689_vm2, %v3261_v41, 0.0 }
 0xdb0   : > { %1863 = vadd.xlane.f32.xlu0 %v1862_v42 }
 0xdbd   : > { %1980 = vrot.lane.b32.xlu1 %v3797_v50, %s4137_s25 }
 0xdc6   : > { %2028 = vrot.lane.b32.xlu0 %v3802_v51, %s4137_s25  ;;  %v1858_v44 = vpop.xlane.xlu0 %1857  ;;  %s4001_s25 = scalar_lea.hbm %s4094_s18, %s2847_s3 }
 0xdc7   : > { %3262 = vrcp.f32 %v1858_v44 }
 0xdca   : > { %v1885_v45 = vpop.permute.xlu0 %1884 }
 0xdcb   : > { %v1890_v46 = vsel %vm933_vm3, %v1885_v45, 0 }
 0xdcc   : > { %3070 = vmatpush3.bf16.msra.mxu1 %v1890_v46 }
 0xdcd   : > { %3081 = vmatprep.subr.bf16.mxu1 %v3366_v8 }
 0xdd4   : > { %v3263_v48 = vpop.eup %3262 }
 0xdd5   : > { %v1872_v49 = vmul.f32 %v3263_v48, %v3255_v24 }
 0xdd7   : > { %v1880_v0 = vpack.c.bf16 %v1872_v49, %v1872_v49  ;;  %1876 = vst.msk [vmem:[%s3856_s24] sm:$0xff] %vm689_vm2, %v1872_v49 }
 0xdd9   : > { %3072 = vmatmul.mubr.msk.bf16.vlgmr.msra.gmra.mxu1 %vm689_vm2, %v1880_v0 }
 0xdda   : > { %3083 = vmatprep.mubr.msk.bf16.mxu1 %vm3367_vm1, %v3366_v8 }
 0xe31   : > { %v1861_v50 = vpop.xlane.xlu1 %1860 }
 0xe32   : > { %3264 = vrcp.f32 %v1861_v50 }
 0xe35   : > { %v1867_v51 = vpop.xlane.xlu1 %1866 }
 0xe36   : > { %3266 = vrcp.f32 %v1867_v51 }
 0xe39   : > { %v1981_v52 = vpop.permute.xlu1 %1980  ;;  %v1864_v53 = vpop.xlane.xlu0 %1863 }
 0xe3a   : > { %v1986_v55 = vsel %vm933_vm3, %v1981_v52, 0  ;;  %3268 = vrcp.f32 %v1864_v53  ;;  %v2794_v53 = vld [vmem:[%s4129_s6 + $0x1] ss:$0 sm:$0xff] }
 0xe3b   : > { %3082 = vmatpush3.bf16.msra.mxu1 %v1986_v55 }
 0xe3c   : > { %3093 = vmatprep.subr.bf16.mxu1 %v3366_v8 }
 0xe3d   : > { %v2029_v58 = vpop.permute.xlu0 %2028 }
 0xe3e   : > { %v2034_v61 = vsel %vm933_vm3, %v2029_v58, 0 }
 0xe3f   : > { %v3265_v56 = vpop.eup %3264 }
 0xe40   : > { %v1873_v57 = vmul.f32 %v3265_v56, %v3257_v37 }
 0xe42   : > { %v1881_v59 = vpack.c.bf16 %v1873_v57, %v1873_v57  ;;  %1877 = vst.msk [vmem:[%s3856_s24 + $0x8] sm:$0xff] %vm689_vm2, %v1873_v57 }
 0xe43   : > { %v3267_v60 = vpop.eup %3266 }
 0xe44   : > { %3078 = vmatmul.mubr.msk.bf16.vlgmr.msra.gmra.mxu0 %vm689_vm2, %v1881_v59  ;;  %v1875_v62 = vmul.f32 %v3267_v60, %v3259_v39 }
 0xe45   : > { %3088 = vmatpush3.bf16.msra.mxu0 %v2034_v61  ;;  %3089 = vmatprep.mubr.msk.bf16.mxu0 %vm3367_vm1, %v3366_v8 }
 0xe46   : > { %3099 = vmatprep.subr.bf16.mxu0 %v3366_v8  ;;  %1879 = vst.msk [vmem:[%s3856_s24 + $0x18] sm:$0xff] %vm689_vm2, %v1875_v62  ;;  %v1883_v4 = vpack.c.bf16 %v1875_v62, %v1875_v62 }
 0xe47   : > { %v3269_v63 = vpop.eup %3268 }
 0xe48   : > { %v1874_v2 = vmul.f32 %v3269_v63, %v3261_v41 }
 0xe4a   : > { %v1882_v3 = vpack.c.bf16 %v1874_v2, %v1874_v2  ;;  %1878 = vst.msk [vmem:[%s3856_s24 + $0x10] sm:$0xff] %vm689_vm2, %v1874_v2  ;;  %v3220_v2 = vld [vmem:[%s4130_s9 + $0x18] sm:$0xff]   ;;  %s3280_s24 = scalar_lea.vmem %s3279_s5, 1024 }
 0xe4b   : > { %p3282_p1 = scmp.lt.s32.totalorder %s3280_s24, %s3274_s22 }
 0xe4c   : > { %3084 = vmatmul.mubr.msk.bf16.vlgmr.msra.gmra.mxu1 %vm689_vm2, %v1882_v3  ;;  %3090 = vmatmul.mubr.msk.bf16.vlgmr.msra.gmra.mxu0 %vm689_vm2, %v1883_v4  ;;  %v3222_v3 = vld [vmem:[%s4087_s11 + $0x78] sm:$0xff]   ;;  %v3223_v4 = vld [vmem:[%s4087_s11 + $0x70] sm:$0xff]  }
 0xe4d   : > { %3094 = vmatpush3.bf16.msra.mxu1 %v2089_v5  ;;  %3095 = vmatprep.mubr.msk.bf16.mxu1 %vm3367_vm1, %v3366_v8  ;;  %v3224_v5 = vld [vmem:[%s4087_s11 + $0x68] sm:$0xff]   ;;  %p3283_p2 = por %p3282_p1, %p3281_p0 }
 0xe4e   : > { %3101 = vmatprep.mubr.msk.bf16.mxu0 %vm3367_vm1, %v3366_v8  ;;  %3105 = vmatprep.subr.bf16.mxu1 %v3366_v8 }
 0xe4f   : > { %3100 = vmatpush3.bf16.msra.mxu0 %v2135_v7  ;;  %v3226_v7 = vld [vmem:[%s4087_s11 + $0x58] sm:$0xff]   ;;  %p3284_p3 = pnand %p3283_p2, %p3277_p13 }
 0xe50   : > { %3111 = vmatprep.subr.bf16.mxu0 %v3366_v8 }
 0xe99   : > { %v1926_v10 = vpop.f32.mrf.mxu1 }
 0xe9a   : > { %v2076_v11 = vpack.c.bf16 %v1926_v10, %v1926_v10 }
 0xe9b   : > { %v3073_v13 = vpop.f32.mrf.mxu1 }
 0xe9c   : > { %3096 = vmatmul.mubr.msk.bf16.vlgmr.msra.gmra.mxu1 %vm689_vm2, %v2076_v11 }
 0xe9d   : > { %v1929_v36 = vpop.f32.mrf.mxu1  ;;  %3106 = vmatpush3.bf16.msra.mxu1 %v2181_v12  ;;  %3107 = vmatprep.mubr.msk.bf16.mxu1 %vm3367_vm1, %v3366_v8 }
 0xe9e   : > { %3117 = vmatprep.subr.bf16.mxu1 %v3366_v8  ;;  %v2797_v36 = vld [vmem:[%s4131_s7 + $0x1] ss:$0 sm:$0xff] }
 0xe9f   : > { %v3074_v14 = vpop.f32.mrf.mxu1 }
 0xf04   : > { %v1974_v16 = vpop.f32.mrf.mxu0 }
 0xf05   : > { %v2077_v17 = vpack.c.bf16 %v1974_v16, %v1974_v16 }
 0xf06   : > { %v3079_v43 = vpop.f32.mrf.mxu0 }
 0xf07   : > { %3102 = vmatmul.mubr.msk.bf16.vlgmr.msra.gmra.mxu0 %vm689_vm2, %v2077_v17  ;;  %v3228_v43 = vld [vmem:[%s4087_s11 + $0x48] sm:$0xff]  }
 0xf08   : > { %v1977_v19 = vpop.f32.mrf.mxu0  ;;  %3112 = vmatpush3.bf16.msra.mxu0 %v2227_v18  ;;  %3113 = vmatprep.mubr.msk.bf16.mxu0 %vm3367_vm1, %v3366_v8 }
 0xf09   : > { %3125 = vmatprep.subr.bf16.mxu0 %v3366_v8  ;;  %v3229_v19 = vld [vmem:[%s4087_s11 + $0x40] sm:$0xff]  }
 0xf0a   : > { %v3080_v20 = vpop.f32.mrf.mxu0 }
 0xf0b   : > { %v2804_v20 = vld [vmem:[%s4086_s10 + $0x1] ss:$0 sm:$0xff] }
 0xf0c   : > { %v2022_v22 = vpop.f32.mrf.mxu1  ;;  %v2070_v54 = vpop.f32.mrf.mxu0 }
 0xf0d   : > { %v2078_v23 = vpack.c.bf16 %v2022_v22, %v2022_v22  ;;  %v2079_v24 = vpack.c.bf16 %v2070_v54, %v2070_v54 }
 0xf0e   : > { %v3085_v28 = vpop.f32.mrf.mxu1  ;;  %v3091_v47 = vpop.f32.mrf.mxu0 }
 0xf0f   : > { %3108 = vmatmul.mubr.msk.bf16.vlgmr.msra.gmra.mxu1 %vm689_vm2, %v2078_v23  ;;  %3114 = vmatmul.mubr.msk.bf16.vlgmr.msra.gmra.mxu0 %vm689_vm2, %v2079_v24 }
 0xf10   : > { %v2025_v29 = vpop.f32.mrf.mxu1  ;;  %v2073_v30 = vpop.f32.mrf.mxu0  ;;  %3121 = vmatprep.mubr.msk.bf16.mxu1 %vm3367_vm1, %v3366_v8  ;;  %3141 = vmatprep.mubr.msk.bf16.mxu0 %vm3367_vm1, %v3366_v8 }
 0xf11   : > { %3118 = vmatpush3.bf16.msra.mxu1 %v3220_v2  ;;  %3126 = vmatpush3.bf16.msra.mxu0 %v3222_v3 }
 0xf12   : > { %v3086_v31 = vpop.f32.mrf.mxu1  ;;  %v3092_v32 = vpop.f32.mrf.mxu0  ;;  %3119 = vmatprep.subr.bf16.mxu1 %v3366_v8  ;;  %3127 = vmatprep.subr.bf16.mxu0 %v3366_v8 }
 0xf13   : > { %v2833_v31 = vld [vmem:[%s4088_s12 + $0x1] ss:$0 sm:$0xff] }
 0xf15   : > { %3128 = vmatpush3.bf16.msra.mxu0 %v3223_v4 }
 0xf16   : > { %3129 = vmatprep.subr.bf16.mxu0 %v3366_v8 }
 0xf19   : > { %3130 = vmatpush3.bf16.msra.mxu0 %v3224_v5 }
 0xf1a   : > { %3131 = vmatprep.subr.bf16.mxu0 %v3366_v8 }
 0xf1d   : > { %3132 = vmatpush3.bf16.msra.mxu0 %v3225_v6 }
 0xf1e   : > { %3133 = vmatprep.subr.bf16.mxu0 %v3366_v8 }
 0xf21   : > { %3134 = vmatpush3.bf16.msra.mxu0 %v3226_v7 }
 0xf22   : > { %3135 = vmatprep.subr.bf16.mxu0 %v3366_v8 }
 0xf25   : > { %3136 = vmatpush3.bf16.msra.mxu0 %v3227_v9 }
 0xf26   : > { %3137 = vmatprep.subr.bf16.mxu0 %v3366_v8 }
 0xf29   : > { %3138 = vmatpush3.bf16.msra.mxu0 %v3228_v43 }
 0xf2a   : > { %3139 = vmatprep.subr.bf16.mxu0 %v3366_v8 }
 0xf2d   : > { %3140 = vmatpush3.bf16.msra.mxu0 %v3229_v19 }
 0xf5c   : > { %v2125_v26 = vpop.f32.mrf.mxu1 }
 0xf5d   : > { %v2269_v40 = vsel %vm590_vm0, %v2125_v26, 0.0 }
 0xf5e   : > { %v3097_v33 = vpop.f32.mrf.mxu1 }
 0xf60   : > { %v2128_v27 = vpop.f32.mrf.mxu1 }
 0xf62   : > { %v3098_v25 = vpop.f32.mrf.mxu1 }
 0xfc7   : > { %v2171_v34 = vpop.f32.mrf.mxu0 }
 0xfc8   : > { %v2270_v38 = vsel %vm590_vm0, %v2171_v34, 0.0 }
 0xfc9   : > { %v3103_v35 = vpop.f32.mrf.mxu0  ;;  %v2271_v41 = vadd.f32 %v2270_v38, %v2269_v40 }
 0xfcb   : > { %v2174_v37 = vpop.f32.mrf.mxu0 }
 0xfcd   : > { %v3104_v39 = vpop.f32.mrf.mxu0 }
 0xfcf   : > { %v2217_v42 = vpop.f32.mrf.mxu1  ;;  %v2263_v44 = vpop.f32.mrf.mxu0 }
 0xfd0   : > { %v2272_v45 = vsel %vm590_vm0, %v2217_v42, 0.0  ;;  %v2274_v0 = vsel %vm590_vm0, %v2263_v44, 0.0  ;;  %v3231_v42 = vld [vmem:[%s4091_s15] sm:$0xff]  }
 0xfd1   : > { %v2273_v46 = vadd.f32 %v2272_v45, %v2271_v41  ;;  %v3109_v48 = vpop.f32.mrf.mxu1  ;;  %v3115_v49 = vpop.f32.mrf.mxu0  ;;  %v3230_v41 = vld [vmem:[%s4091_s15 + $0x8] sm:$0xff]  }
 0xfd2   : > { %v2834_v49 = vld [vmem:[%s4089_s13] ss:$0 sm:$0xff] }
 0xfd3   : > { %v2275_v50 = vadd.f32 %v2274_v0, %v2273_v46  ;;  %v2220_v51 = vpop.f32.mrf.mxu1  ;;  %v2266_v52 = vpop.f32.mrf.mxu0 }
 0xfd5   : > { %v2276_v55 = vadd.f32 %v2275_v50, %v3764_v21  ;;  %v3110_v56 = vpop.f32.mrf.mxu1  ;;  %v3116_v57 = vpop.f32.mrf.mxu0  ;;  %v3221_v21 = vld [vmem:[%s4130_s9 + $0x10] sm:$0xff]   ;;  %v2835_v50 = vld [vmem:[%s4090_s14] ss:$0 sm:$0xff] }
 0xfd6   : > { %3120 = vmatpush3.bf16.msra.mxu1 %v3221_v21 }
 0xfd7   : > { %v2285_v58 = vadd.f32 %v2794_v53, %v2276_v55  ;;  %3145 = vmatprep.subr.bf16.mxu1 %v3366_v8 }
 0xfd9   : > { %v2290_v59 = vsel %vm590_vm0, %v2285_v58, 0.0 }
 0xfda   : > { %2291 = vadd.xlane.f32.xlu1 %v2290_v59 }
0x1063   : > { %v2292_v60 = vpop.xlane.xlu1 %2291 }
0x1064   : > { %v2293_v61 = vmul.f32 0.03125, %v2292_v60 }
0x1066   : > { %v2294_v62 = vsub.f32 %v2285_v58, %v2293_v61 }
0x1068   : > { %v2295_v63 = vmul.f32 %v2294_v62, %v2294_v62 }
0x106a   : > { %v2296_v1 = vsel %vm590_vm0, %v2295_v63, 0.0 }
0x106b   : > { %2297 = vadd.xlane.f32.xlu0 %v2296_v1 }
0x10f4   : > { %v2298_v10 = vpop.xlane.xlu0 %2297 }
0x10f5   : > { %v2299_v11 = vmul.f32 0.03125, %v2298_v10 }
0x10f7   : > { %v2300_v12 = vadd.f32 1e-05, %v2299_v11 }
0x10f9   : > { %3270 = vrsqrt.f32 %v2300_v12 }
0x1106   : > { %v3271_v13 = vpop.eup %3270 }
0x1107   : > { %v2302_v14 = vmul.f32 %v3271_v13, %v2294_v62 }
0x1109   : > { %v2309_v16 = vmul.f32 %v2797_v36, %v2302_v14 }
0x110b   : > { %v2316_v17 = vadd.f32 %v2798_v15, %v2309_v16 }
0x110d   : > { %v2317_v18 = vpack.c.bf16 %v2316_v17, %v2316_v17 }
0x110f   : > { %3122 = vmatmul.mubr.msk.bf16.vlgmr.msra.gmra.mxu1 %vm590_vm0, %v2317_v18 }
0x1110   : > { %3149 = vmatprep.mubr.msk.bf16.mxu1 %vm3367_vm1, %v3366_v8  ;;  %3146 = vmatpush3.bf16.msra.mxu1 %v3230_v41 }
0x1111   : > { %3147 = vmatprep.subr.bf16.mxu1 %v3366_v8 }
0x1114   : > { %3148 = vmatpush3.bf16.msra.mxu1 %v3231_v42 }
0x11cf   : > { %v2380_v22 = vpop.f32.mrf.mxu1 }
0x11d0   : > { %v2381_v54 = vadd.f32 %v2804_v20, %v2380_v22 }
0x11d1   : > { %v3123_v23 = vpop.f32.mrf.mxu1 }
0x11d2   : > { %v2386_v24 = vmax.f32 %v2381_v54, 0.0 }
0x11d3   : > { %v2383_v28 = vpop.f32.mrf.mxu1 }
0x11d4   : > { %v2387_v47 = vpack.c.bf16 %v2386_v24, %v2386_v24 }
0x11d5   : > { %v3124_v29 = vpop.f32.mrf.mxu1 }
0x11d6   : > { %3142 = vmatmul.mubr.bf16.vlgmr.msra.gmra.mxu0 %v2387_v47 }
0x1296   : > { %v2487_v30 = vpop.f32.mrf.mxu0 }
0x1297   : > { %v2493_v32 = vadd.f32 %v2487_v30, %v2285_v58 }
0x1298   : > { %v3143_v26 = vpop.f32.mrf.mxu0 }
0x1299   : > { %v2502_v33 = vadd.f32 %v2833_v31, %v2493_v32 }
0x129a   : > { %v2490_v27 = vpop.f32.mrf.mxu0 }
0x129b   : > { %v2505_v25 = vsel %vm590_vm0, %v2502_v33, 0.0 }
0x129c   : > { %2506 = vadd.xlane.f32.xlu0 %v2505_v25  ;;  %v3144_v34 = vpop.f32.mrf.mxu0 }
0x1325   : > { %v2507_v35 = vpop.xlane.xlu0 %2506 }
0x1326   : > { %v2508_v37 = vmul.f32 0.03125, %v2507_v35 }
0x1328   : > { %v2509_v38 = vsub.f32 %v2502_v33, %v2508_v37 }
0x132a   : > { %v2510_v39 = vmul.f32 %v2509_v38, %v2509_v38 }
0x132c   : > { %v2511_v40 = vsel %vm590_vm0, %v2510_v39, 0.0 }
0x132d   : > { %2512 = vadd.xlane.f32.xlu1 %v2511_v40 }
0x13b6   : > { %v2513_v44 = vpop.xlane.xlu1 %2512 }
0x13b7   : > { %v2514_v45 = vmul.f32 0.03125, %v2513_v44 }
0x13b9   : > { %v2515_v46 = vadd.f32 1e-05, %v2514_v45 }
0x13bb   : > { %3272 = vrsqrt.f32 %v2515_v46 }
0x13c8   : > { %v3273_v48 = vpop.eup %3272 }
0x13c9   : > { %v2517_v0 = vmul.f32 %v3273_v48, %v2509_v38 }
0x13cb   : > { %v2524_v51 = vmul.f32 %v2834_v49, %v2517_v0 }
0x13cd   : > { %v2531_v8 = vadd.f32 %v2835_v50, %v2524_v51 }
0x13cf   : > { %v2532_v52 = vpack.c.bf16 %v2531_v8, %v2531_v8 }
0x13d1   : > { %3150 = vmatmul.mubr.msk.bf16.vlgmr.msra.gmra.mxu1 %vm590_vm0, %v2532_v52 }
0x13d2   : > { %3287 = shalt.err (!%p3284_p3)
}
0x13d3   : > { %s3288_s3 = scalar_lea.hbm %s4001_s25, 512  ;;  %s3292_s29 = scalar_lea.hbm %s4094_s18, 1024 }
0x13d4   : > { %p3289_p4 = scmp.ne.s32.totalorder %s4001_s25, %s3288_s3  ;;  %p3293_p9 = scmp.lt.s32.totalorder %s4001_s25, %s4094_s18 }
0x13d5   : > { %p3294_p10 = scmp.lt.s32.totalorder %s3292_s29, %s3288_s3 }
0x13d6   : > { %p3290_p7 = pnand %p3289_p4, %p3510_p5 }
0x13d7   : > { %p3295_p11 = por %p3294_p10, %p3293_p9 }
0x13d8   : > { %p3291_p8 = pneg %p3290_p7 }
0x13da   : > { %p3296_p12 = pnand %p3295_p11, %p3291_p8 }
0x13dc   : > { %3299 = shalt.err (!%p3296_p12)
}
0x13dd   : > { %s3374_s5 = smov 128   ;;  %s3375_s22 = smov 8   ;;  %v2836_v53 = vld [vmem:[%s4092_s16] ss:$0 sm:$0xff] }
0x13de   : > { %s4138_s24 = scalar_lea.sflag [#allocation5], %s3853_s26  ;;  %s2730_s4 = sshll.u32 %s3853_s26, 3 }
0x13df   : > { %3154 = dma.vmem_to_hbm [thread:$0]  (%p3510_p5), %s3995_s1, 512, %s4001_s25, %s4138_s24, %s3374_s5, %s3374_s5, %s3375_s22  }
0x13e0   : > { %s2842_s3 = sshll.u32 %s3493_s0, 7  ;;  %s570_s19 = scalar_lea.vmem [#allocation2], %s2730_s4 }
0x13e1   : > { %s2619_s29 = sshll.u32 %s570_s19, 4  ;;  %s4034_s9 = scalar_lea.hbm %s4093_s17, %s2842_s3  ;;  %s4036_s29 = int_to_ptr.vmem [resolvable:$true] %s2619_s29 }
0x13e2   : > { %s2601_s1 = scalar_lea.sflag [#allocation3], %s3853_s26  ;;  %s3300_s25 = scalar_lea.vmem %s4036_s29, 128 }
0x13e3   : > { %p3301_p13 = scmp.ne.s32.totalorder %s4036_s29, %s3300_s25  ;;  %s3376_s0 = smov [#allocation2]  }
0x13e4   : > { %s3304_s5 = sshll.u32 %s3376_s0, 4  ;;  %s3305_s5 = int_to_ptr.vmem [resolvable:$false] %s3304_s5 }
0x13e5   : > { %p3302_p0 = pnand %p3301_p13, %p3510_p5  ;;  %s3306_s7 = scalar_lea.vmem %s3305_s5, 256 }
0x13e6   : > { %p3307_p2 = scmp.lt.s32.totalorder %s4036_s29, %s3305_s5  ;;  %p3308_p3 = scmp.lt.s32.totalorder %s3306_s7, %s3300_s25 }
0x13e7   : > { %p3303_p1 = pneg %p3302_p0 }
0x13e8   : > { %p3309_p4 = por %p3308_p3, %p3307_p2 }
0x13ea   : > { %p3310_p7 = pnand %p3309_p4, %p3303_p1 }
0x1491   : > { %v2593_v55 = vpop.f32.mrf.mxu1 }
0x1492   : > { %v2594_v56 = vadd.f32 %v2836_v53, %v2593_v55 }
0x1493   : > { %v3151_v57 = vpop.f32.mrf.mxu1 }
0x1494   : > { %2599 = vst [vmem:[%s570_s19] sm:$0xff] %v2594_v56 }
0x1495   : > { %v2596_v58 = vpop.f32.mrf.mxu1 }
0x1496   : > { %3313 = shalt.err (!%p3310_p7)
}
0x1497   : > { %s3314_s8 = scalar_lea.hbm %s4034_s9, 128  ;;  %s3318_s24 = scalar_lea.hbm %s4093_s17, 256 }
0x1498   : > { %p3315_p8 = scmp.ne.s32.totalorder %s4034_s9, %s3314_s8  ;;  %p3319_p11 = scmp.lt.s32.totalorder %s4034_s9, %s4093_s17 }
0x1499   : > { %p3320_p12 = scmp.lt.s32.totalorder %s3318_s24, %s3314_s8 }
0x149a   : > { %p3316_p9 = pnand %p3315_p8, %p3510_p5 }
0x149b   : > { %p3321_p13 = por %p3320_p12, %p3319_p11 }
0x149c   : > { %p3317_p10 = pneg %p3316_p9 }
0x149e   : > { %p3322_p0 = pnand %p3321_p13, %p3317_p10 }
0x14a0   : > { %3325 = shalt.err (!%p3322_p0)
}
0x14a1   : > { %3153 = dma.vmem_to_hbm [thread:$0]  (%p3510_p5), %s4036_s29, 128, %s4034_s9, %s2601_s1   ;;  %v3152_v59 = vpop.f32.mrf.mxu1 }
0x14a2 PF: > { %p3164_p1 = scmp.ge.s32.totalorder %s3364_s30, 2  ;;  %s2647_s21 = sand.u32 1, %s3352_s27  }
0x14a3   : > { %s2648_s3 = scalar_lea.sflag [#allocation3], %s2647_s21 }
0x14a4   : > { %p3158_p2 = pnand %p3164_p1, %p3514_p6 }
0x14a6   : > { %p3159_p3 = pneg %p3158_p2 }
0x14a8   : > { %3343 = dma.done.wait (%p3159_p3), %s2648_s3, 128  }
0x14a9   : > { %3345 = vsyncadd (%p3159_p3), %s2648_s3, 4294967168  ;;  %s2657_s19 = scalar_lea.sflag [#allocation5], %s2647_s21 }
0x14aa   : > { %3347 = dma.done.wait (%p3159_p3), %s2657_s19, 512  }
0x14ab   : > { %3349 = vsyncadd (%p3159_p3), %s2657_s19, 4294966784  ;;  %s4139_s30 = sld [smem:[#allocation9_spill]]  ;;  %s4142_s27 = smov %s3356_s28 }
0x14ac   : > { %s4140_s2 = sld [smem:[#allocation8_spill]] }
0x14ad   : > { %s4141_s29 = sld [smem:[#allocation10_spill]] }
0x14b1   : > { %p32_p5 = scmp.ge.s32.totalorder %s4139_s30, 4  }
0x14b2   : > { %s4143_s28 = smov %s4140_s2 }
0x14b3   :  { %34 = sbr.rel (!%p32_p5) target bundleno = 16 (0x10), region = 151 }
0x14b8   :  { %2662 = vsyncpa [#allocation3], 1 }
0x14b9   :  { %2664 = vsyncpa [#allocation3 + $0x1], 1 }
0x14ba   :  { %2665 = vsyncpa [#allocation5], 1 }
0x14bb   :  { %2667 = vsyncpa [#allocation5 + $0x1], 1 }

</bundles_post_ra>
